<compile_context>
chip_gen: v5e
topology: v5e:2x2
jax: 0.10.0
libtpu: 0.0.40
codegen_flags: <defaults>
</compile_context>

<pallas_src>
import math

import jax
import jax.numpy as jnp
from jax.experimental import pallas as pl
from jax.experimental.pallas import tpu as pltpu


# ----------------------------------------------------------------------------
# Fused forward kernel (whole network, one batch sample per grid step)
# ----------------------------------------------------------------------------
def _build_fused_kernel(net, *, L, cin, cpad, kmax, padmax):
    def kernel(x_ref, w_ref, b_ref, reg_ref, cla_ref):
        # Reused zero tile for 'same' padding along L (in-VMEM, no XLA pad op).
        zpad = jnp.zeros((cpad, padmax), jnp.float32) if padmax > 0 else None

        # Channel-pad the (cin, L) input tile to (cpad, L) once; padded channels
        # stay exactly zero through the whole network.
        x = x_ref[0]
        if cin < cpad:
            x = jnp.concatenate([x, jnp.zeros((cpad - cin, L), jnp.float32)], axis=0)

        def conv(v, idx, K, dil, relu=False):
            # 'same'-padded dilated conv + bias (+ReLU) as ONE MXU matmul:
            # stack the K lane-shifted windows along sublanes -> (K*cpad, L) and
            # multiply by the packed (cpad, K*cpad) weight (contraction K*cpad).
            pad = dil * (K - 1) // 2
            a = jnp.concatenate([zpad[:, :pad], v, zpad[:, :pad]], axis=1) if pad else v
            wins = [a[:, k * dil:k * dil + L] for k in range(K)]
            xcat = wins[0] if K == 1 else jnp.concatenate(wins, axis=0)
            w = w_ref[idx]                         # (cpad, kmax*cpad), resident in VMEM
            if K < kmax:
                w = w[:, :K * cpad]
            acc = jnp.dot(w, xcat, preferred_element_type=jnp.float32) + b_ref[idx]
            return jnp.maximum(acc, 0.0) if relu else acc

        def res_block(v, blk):
            K, dil = blk['K'], blk['dil']
            identity = conv(v, blk['skip'], 1, 1) if blk['skip'] is not None else v
            out = conv(v, blk['c1'], K, dil, relu=True)
            out = conv(out, blk['c2'], K, dil, relu=True)
            out = conv(out, blk['c3'], K, dil) + identity      # conv3 + residual
            return jnp.maximum(out, 0.0)                       # + ReLU

        h = x
        for blk in net['reg_blocks']:
            h = res_block(h, blk)
        reg = conv(h, net['reg_head'], 1, 1, relu=True)        # regressor (k=1, ReLU)
        reg_ref[0] = reg[:1, :]                                # out_reg = x.squeeze(1)

        h = reg                                                # rows >= 1 are exact zeros
        for blk in net['cls_blocks']:
            h = res_block(h, blk)
        cla = conv(h, net['cls_head'], 1, 1)                   # classifier (k=1, no act)
        cla_ref[0] = 1.0 / (1.0 + jnp.exp(-cla[:1, :]))        # sigmoid(squeeze(1))

    return kernel


def denoising_resnet_forward(x, params, meta):
    w_all, b_all = params
    N, cin, L = x.shape
    assert cin == meta['cin']
    cpad, kmax, padmax, net = meta['cpad'], meta['kmax'], meta['padmax'], meta['net']
    nl = w_all.shape[0]

    kernel = _build_fused_kernel(net, L=L, cin=cin, cpad=cpad, kmax=kmax, padmax=padmax)

    out_reg, out_cla = pl.pallas_call(
        kernel,
        out_shape=(jax.ShapeDtypeStruct((N, 1, L), jnp.float32),
                   jax.ShapeDtypeStruct((N, 1, L), jnp.float32)),
        grid_spec=pltpu.PrefetchScalarGridSpec(
            num_scalar_prefetch=0,
            grid=(N,),                                                       # batch only
            in_specs=[
                pl.BlockSpec((1, cin, L), lambda n: (n, 0, 0)),              # one sample / step
                pl.BlockSpec((nl, cpad, kmax * cpad), lambda n: (0, 0, 0)),  # all weights, resident
                pl.BlockSpec((nl, cpad, 1), lambda n: (0, 0, 0)),            # all biases, resident
            ],
            out_specs=(pl.BlockSpec((1, 1, L), lambda n: (n, 0, 0)),
                       pl.BlockSpec((1, 1, L), lambda n: (n, 0, 0))),
        ),
        compiler_params=pltpu.CompilerParams(
            dimension_semantics=("parallel",),    # v7x: the two TensorCores split the batch
        ),
    )(x, w_all, b_all)

    return out_reg[:, 0, :], out_cla[:, 0, :]


# ----------------------------------------------------------------------------
# Deterministic synthetic parameters, packed for the fused kernel
# ----------------------------------------------------------------------------
def _rand_conv(key, K, cin, cout, bias):
    wk, bk = jax.random.split(key)
    scale = 1.0 / math.sqrt(cin * K)
    w = jax.random.normal(wk, (K, cout, cin), jnp.float32) * scale
    b = jax.random.normal(bk, (cout,), jnp.float32) * scale if bias else None
    return w, b


def _pack_conv(w, b, *, cpad, kmax):
    """(K, cout, cin) weight -> (cpad, kmax*cpad) so conv is one matmul in-kernel."""
    K, cout, cin = w.shape
    buf = jnp.zeros((cpad, kmax, cpad), jnp.float32)
    buf = buf.at[:cout, :K, :cin].set(jnp.transpose(w, (1, 0, 2)))
    wp = buf.reshape(cpad, kmax * cpad)
    bp = jnp.zeros((cpad, 1), jnp.float32)
    if b is not None:
        bp = bp.at[:cout, 0].set(b)
    return wp, bp


def init_model(key, *, in_channels=1, out_channels=8, num_blocks=2, kernel_size=5,
               dilation=2, num_blocks_class=2, kernel_size_class=5, dilation_class=2,
               out_channels_class=8):
    assert kernel_size % 2 == 1 and kernel_size_class % 2 == 1, "'same' padding needs odd kernels"
    # The original module wires the classifier with in_channels=out_channels (the
    # regression width); that only type-checks when the two widths match.
    assert out_channels == out_channels_class

    cpad = -(-max(in_channels, out_channels, out_channels_class) // 8) * 8
    kmax = max(kernel_size, kernel_size_class)
    padmax = max(dilation * (kernel_size - 1) // 2,
                 dilation_class * (kernel_size_class - 1) // 2)

    keys = list(jax.random.split(key, 4 * (num_blocks + num_blocks_class) + 2))
    ki = [0]
    packed_w, packed_b, raw = [], [], []

    def add_layer(K, cin, cout, bias):
        k = keys[ki[0]]; ki[0] += 1
        w, b = _rand_conv(k, K, cin, cout, bias)
        wp, bp = _pack_conv(w, b, cpad=cpad, kmax=kmax)
        packed_w.append(wp); packed_b.append(bp); raw.append((w, b))
        return len(raw) - 1

    def add_block(cin, cout, K, dil, conv_input, bias):
        return dict(K=K, dil=dil,
                    c1=add_layer(K, cin, cout, bias),
                    c2=add_layer(K, cout, cout, bias),
                    c3=add_layer(K, cout, cout, bias),
                    skip=add_layer(1, cin, cout, bias) if conv_input else None)

    net = dict(reg_blocks=[], cls_blocks=[])
    net['reg_blocks'].append(add_block(in_channels, out_channels, kernel_size, dilation, True, False))
    for _ in range(num_blocks - 1):
        net['reg_blocks'].append(add_block(out_channels, out_channels, kernel_size, dilation, False, False))
    net['reg_head'] = add_layer(1, out_channels, 1, False)         # ConvAct1d(.., relu, bias=False)
    net['cls_blocks'].append(add_block(1, out_channels_class, kernel_size_class, dilation_class, True, True))
    for _ in range(num_blocks_class - 1):
        net['cls_blocks'].append(add_block(out_channels_class, out_channels_class,
                                           kernel_size_class, dilation_class, False, True))
    net['cls_head'] = add_layer(1, out_channels, 1, True)          # module quirk: cin=out_channels

    params = (jnp.stack(packed_w), jnp.stack(packed_b))
    meta = dict(net=net, cin=in_channels, cpad=cpad, kmax=kmax, padmax=padmax)
    return params, meta, raw


# ----------------------------------------------------------------------------
# Pure-JAX reference (for correctness check)
# ----------------------------------------------------------------------------
def _conv_ref(x, w, b, dil, relu):
    K = w.shape[0]
    L = x.shape[2]
    pad = dil * (K - 1) // 2
    xp = jnp.pad(x, ((0, 0), (0, 0), (pad, pad)))
    y = sum(jnp.einsum('oc,ncl->nol', w[k], xp[:, :, k * dil:k * dil + L]) for k in range(K))
    if b is not None:
        y = y + b[None, :, None]
    return jnp.maximum(y, 0.0) if relu else y


def _res_block_ref(x, blk, raw):
    identity = _conv_ref(x, *raw[blk['skip']], 1, False) if blk['skip'] is not None else x
    out = _conv_ref(x, *raw[blk['c1']], blk['dil'], True)
    out = _conv_ref(out, *raw[blk['c2']], blk['dil'], True)
    out = _conv_ref(out, *raw[blk['c3']], blk['dil'], False) + identity
    return jnp.maximum(out, 0.0)


def _forward_ref(x, raw, net):
    h = x
    for blk in net['reg_blocks']:
        h = _res_block_ref(h, blk, raw)
    h = _conv_ref(h, *raw[net['reg_head']], 1, True)
    out_reg = h[:, 0, :]
    c = h
    for blk in net['cls_blocks']:
        c = _res_block_ref(c, blk, raw)
    c = _conv_ref(c, *raw[net['cls_head']], 1, False)
    out_cla = 1.0 / (1.0 + jnp.exp(-c[:, 0, :]))
    return out_reg, out_cla


if __name__ == "__main__":
    key = jax.random.PRNGKey(0)
    pkey, xkey = jax.random.split(key)

    # Small config consistent with the module defaults (scaled down).
    params, meta, raw = init_model(pkey, in_channels=1, out_channels=8, num_blocks=2,
                                   kernel_size=5, dilation=2, num_blocks_class=2,
                                   kernel_size_class=5, dilation_class=2,
                                   out_channels_class=8)

    N, L = 2, 256                         # batch=2, interval_size=256
    x = jax.random.normal(xkey, (N, 1, L), jnp.float32)

    fwd = jax.jit(lambda xx: denoising_resnet_forward(xx, params, meta))
    out_reg, out_cla = fwd(x)
    jax.block_until_ready((out_reg, out_cla))

    assert out_reg.shape == (N, L), out_reg.shape
    assert out_cla.shape == (N, L), out_cla.shape
    assert bool(jnp.all(jnp.isfinite(out_reg))) and bool(jnp.all(jnp.isfinite(out_cla)))

    ref_reg, ref_cla = _forward_ref(x, raw, meta['net'])
    assert jnp.allclose(out_reg, ref_reg, atol=1e-4, rtol=1e-4), \
        float(jnp.max(jnp.abs(out_reg - ref_reg)))
    assert jnp.allclose(out_cla, ref_cla, atol=1e-4, rtol=1e-4), \
        float(jnp.max(jnp.abs(out_cla - ref_cla)))

    print("KERNEL_OK")
</pallas_src>

<mosaic_0001>
module attributes {stable_mosaic.version = 11 : i64} {
  func.func @kernel(%arg0: i32, %arg1: memref<1x1x256xf32, #tpu.memory_space<vmem>>, %arg2: memref<16x8x40xf32, #tpu.memory_space<vmem>>, %arg3: memref<16x8x1xf32, #tpu.memory_space<vmem>>, %arg4: memref<1x1x256xf32, #tpu.memory_space<vmem>>, %arg5: memref<1x1x256xf32, #tpu.memory_space<vmem>>) attributes {dimension_semantics = [#tpu.dimension_semantics<parallel>], iteration_bounds = array<i64: 2>, scalar_prefetch = 0 : i64, scratch_operands = 0 : i64, tpu.core_type = #tpu.core_type<tc>, window_params = [{transform_indices = @transform_0, window_bounds = array<i64: 1, 1, 256>}, {pipeline_mode = #tpu.pipeline_mode<synchronous>, transform_indices = @transform_1, window_bounds = array<i64: 16, 8, 40>}, {pipeline_mode = #tpu.pipeline_mode<synchronous>, transform_indices = @transform_2, window_bounds = array<i64: 16, 8, 1>}, {transform_indices = @transform_3, window_bounds = array<i64: 1, 1, 256>}, {transform_indices = @transform_4, window_bounds = array<i64: 1, 1, 256>}]} {
    %cst = arith.constant 0.000000e+00 : f32
    %0 = vector.broadcast %cst : f32 to vector<8x4xf32>
    %c0 = arith.constant 0 : index
    %c0_0 = arith.constant 0 : index
    %c0_1 = arith.constant 0 : index
    %1 = vector.load %arg1[%c0, %c0_0, %c0_1] : memref<1x1x256xf32, #tpu.memory_space<vmem>>, vector<1x1x256xf32>
    %2 = vector.shape_cast %1 : vector<1x1x256xf32> to vector<1x256xf32>
    %cst_2 = arith.constant 0.000000e+00 : f32
    %3 = vector.broadcast %cst_2 : f32 to vector<7x256xf32>
    %4 = tpu.concatenate %2, %3 in 0 : vector<1x256xf32>, vector<7x256xf32> -> vector<8x256xf32>
    %c3 = arith.constant 3 : index
    %c0_3 = arith.constant 0 : index
    %c0_4 = arith.constant 0 : index
    %5 = vector.load %arg2[%c3, %c0_3, %c0_4] : memref<16x8x40xf32, #tpu.memory_space<vmem>>, vector<1x8x40xf32>
    %6 = vector.shape_cast %5 : vector<1x8x40xf32> to vector<8x40xf32>
    %7 = vector.extract_strided_slice %6 {offsets = [0, 0], sizes = [8, 8], strides = [1, 1]} : vector<8x40xf32> to vector<8x8xf32>
    %cst_5 = arith.constant dense<0.000000e+00> : vector<8x256xf32>
    %8 = tpu.matmul %7, %4, %cst_5 {dimension_numbers = #tpu.dot_dimension_numbers<[1], [0], [0], [1], [0, 0, 1, 1], [], []>} : vector<8x8xf32>, vector<8x256xf32>, vector<8x256xf32> -> vector<8x256xf32>
    %c3_6 = arith.constant 3 : index
    %c0_7 = arith.constant 0 : index
    %c0_8 = arith.constant 0 : index
    %9 = vector.load %arg3[%c3_6, %c0_7, %c0_8] : memref<16x8x1xf32, #tpu.memory_space<vmem>>, vector<1x8x1xf32>
    %10 = vector.shape_cast %9 : vector<1x8x1xf32> to vector<8x1xf32>
    %11 = vector.broadcast %10 : vector<8x1xf32> to vector<8x256xf32>
    %12 = arith.addf %8, %11 : vector<8x256xf32>
    %13 = tpu.concatenate %0, %4, %0 in 1 : vector<8x4xf32>, vector<8x256xf32>, vector<8x4xf32> -> vector<8x264xf32>
    %14 = vector.extract_strided_slice %13 {offsets = [0, 0], sizes = [8, 256], strides = [1, 1]} : vector<8x264xf32> to vector<8x256xf32>
    %15 = vector.extract_strided_slice %13 {offsets = [0, 2], sizes = [8, 256], strides = [1, 1]} : vector<8x264xf32> to vector<8x256xf32>
    %16 = vector.extract_strided_slice %13 {offsets = [0, 4], sizes = [8, 256], strides = [1, 1]} : vector<8x264xf32> to vector<8x256xf32>
    %17 = vector.extract_strided_slice %13 {offsets = [0, 6], sizes = [8, 256], strides = [1, 1]} : vector<8x264xf32> to vector<8x256xf32>
    %18 = vector.extract_strided_slice %13 {offsets = [0, 8], sizes = [8, 256], strides = [1, 1]} : vector<8x264xf32> to vector<8x256xf32>
    %19 = tpu.concatenate %14, %15, %16, %17, %18 in 0 : vector<8x256xf32>, vector<8x256xf32>, vector<8x256xf32>, vector<8x256xf32>, vector<8x256xf32> -> vector<40x256xf32>
    %c0_9 = arith.constant 0 : index
    %c0_10 = arith.constant 0 : index
    %c0_11 = arith.constant 0 : index
    %20 = vector.load %arg2[%c0_9, %c0_10, %c0_11] : memref<16x8x40xf32, #tpu.memory_space<vmem>>, vector<1x8x40xf32>
    %21 = vector.shape_cast %20 : vector<1x8x40xf32> to vector<8x40xf32>
    %cst_12 = arith.constant dense<0.000000e+00> : vector<8x256xf32>
    %22 = tpu.matmul %21, %19, %cst_12 {dimension_numbers = #tpu.dot_dimension_numbers<[1], [0], [0], [1], [0, 0, 1, 1], [], []>} : vector<8x40xf32>, vector<40x256xf32>, vector<8x256xf32> -> vector<8x256xf32>
    %c0_13 = arith.constant 0 : index
    %c0_14 = arith.constant 0 : index
    %c0_15 = arith.constant 0 : index
    %23 = vector.load %arg3[%c0_13, %c0_14, %c0_15] : memref<16x8x1xf32, #tpu.memory_space<vmem>>, vector<1x8x1xf32>
    %24 = vector.shape_cast %23 : vector<1x8x1xf32> to vector<8x1xf32>
    %25 = vector.broadcast %24 : vector<8x1xf32> to vector<8x256xf32>
    %26 = arith.addf %22, %25 : vector<8x256xf32>
    %cst_16 = arith.constant 0.000000e+00 : f32
    %27 = vector.broadcast %cst_16 : f32 to vector<8x256xf32>
    %28 = arith.maximumf %26, %27 : vector<8x256xf32>
    %29 = tpu.concatenate %0, %28, %0 in 1 : vector<8x4xf32>, vector<8x256xf32>, vector<8x4xf32> -> vector<8x264xf32>
    %30 = vector.extract_strided_slice %29 {offsets = [0, 0], sizes = [8, 256], strides = [1, 1]} : vector<8x264xf32> to vector<8x256xf32>
    %31 = vector.extract_strided_slice %29 {offsets = [0, 2], sizes = [8, 256], strides = [1, 1]} : vector<8x264xf32> to vector<8x256xf32>
    %32 = vector.extract_strided_slice %29 {offsets = [0, 4], sizes = [8, 256], strides = [1, 1]} : vector<8x264xf32> to vector<8x256xf32>
    %33 = vector.extract_strided_slice %29 {offsets = [0, 6], sizes = [8, 256], strides = [1, 1]} : vector<8x264xf32> to vector<8x256xf32>
    %34 = vector.extract_strided_slice %29 {offsets = [0, 8], sizes = [8, 256], strides = [1, 1]} : vector<8x264xf32> to vector<8x256xf32>
    %35 = tpu.concatenate %30, %31, %32, %33, %34 in 0 : vector<8x256xf32>, vector<8x256xf32>, vector<8x256xf32>, vector<8x256xf32>, vector<8x256xf32> -> vector<40x256xf32>
    %c1 = arith.constant 1 : index
    %c0_17 = arith.constant 0 : index
    %c0_18 = arith.constant 0 : index
    %36 = vector.load %arg2[%c1, %c0_17, %c0_18] : memref<16x8x40xf32, #tpu.memory_space<vmem>>, vector<1x8x40xf32>
    %37 = vector.shape_cast %36 : vector<1x8x40xf32> to vector<8x40xf32>
    %cst_19 = arith.constant dense<0.000000e+00> : vector<8x256xf32>
    %38 = tpu.matmul %37, %35, %cst_19 {dimension_numbers = #tpu.dot_dimension_numbers<[1], [0], [0], [1], [0, 0, 1, 1], [], []>} : vector<8x40xf32>, vector<40x256xf32>, vector<8x256xf32> -> vector<8x256xf32>
    %c1_20 = arith.constant 1 : index
    %c0_21 = arith.constant 0 : index
    %c0_22 = arith.constant 0 : index
    %39 = vector.load %arg3[%c1_20, %c0_21, %c0_22] : memref<16x8x1xf32, #tpu.memory_space<vmem>>, vector<1x8x1xf32>
    %40 = vector.shape_cast %39 : vector<1x8x1xf32> to vector<8x1xf32>
    %41 = vector.broadcast %40 : vector<8x1xf32> to vector<8x256xf32>
    %42 = arith.addf %38, %41 : vector<8x256xf32>
    %cst_23 = arith.constant 0.000000e+00 : f32
    %43 = vector.broadcast %cst_23 : f32 to vector<8x256xf32>
    %44 = arith.maximumf %42, %43 : vector<8x256xf32>
    %45 = tpu.concatenate %0, %44, %0 in 1 : vector<8x4xf32>, vector<8x256xf32>, vector<8x4xf32> -> vector<8x264xf32>
    %46 = vector.extract_strided_slice %45 {offsets = [0, 0], sizes = [8, 256], strides = [1, 1]} : vector<8x264xf32> to vector<8x256xf32>
    %47 = vector.extract_strided_slice %45 {offsets = [0, 2], sizes = [8, 256], strides = [1, 1]} : vector<8x264xf32> to vector<8x256xf32>
    %48 = vector.extract_strided_slice %45 {offsets = [0, 4], sizes = [8, 256], strides = [1, 1]} : vector<8x264xf32> to vector<8x256xf32>
    %49 = vector.extract_strided_slice %45 {offsets = [0, 6], sizes = [8, 256], strides = [1, 1]} : vector<8x264xf32> to vector<8x256xf32>
    %50 = vector.extract_strided_slice %45 {offsets = [0, 8], sizes = [8, 256], strides = [1, 1]} : vector<8x264xf32> to vector<8x256xf32>
    %51 = tpu.concatenate %46, %47, %48, %49, %50 in 0 : vector<8x256xf32>, vector<8x256xf32>, vector<8x256xf32>, vector<8x256xf32>, vector<8x256xf32> -> vector<40x256xf32>
    %c2 = arith.constant 2 : index
    %c0_24 = arith.constant 0 : index
    %c0_25 = arith.constant 0 : index
    %52 = vector.load %arg2[%c2, %c0_24, %c0_25] : memref<16x8x40xf32, #tpu.memory_space<vmem>>, vector<1x8x40xf32>
    %53 = vector.shape_cast %52 : vector<1x8x40xf32> to vector<8x40xf32>
    %cst_26 = arith.constant dense<0.000000e+00> : vector<8x256xf32>
    %54 = tpu.matmul %53, %51, %cst_26 {dimension_numbers = #tpu.dot_dimension_numbers<[1], [0], [0], [1], [0, 0, 1, 1], [], []>} : vector<8x40xf32>, vector<40x256xf32>, vector<8x256xf32> -> vector<8x256xf32>
    %c2_27 = arith.constant 2 : index
    %c0_28 = arith.constant 0 : index
    %c0_29 = arith.constant 0 : index
    %55 = vector.load %arg3[%c2_27, %c0_28, %c0_29] : memref<16x8x1xf32, #tpu.memory_space<vmem>>, vector<1x8x1xf32>
    %56 = vector.shape_cast %55 : vector<1x8x1xf32> to vector<8x1xf32>
    %57 = vector.broadcast %56 : vector<8x1xf32> to vector<8x256xf32>
    %58 = arith.addf %54, %57 : vector<8x256xf32>
    %59 = arith.addf %58, %12 : vector<8x256xf32>
    %cst_30 = arith.constant 0.000000e+00 : f32
    %60 = vector.broadcast %cst_30 : f32 to vector<8x256xf32>
    %61 = arith.maximumf %59, %60 : vector<8x256xf32>
    %62 = tpu.concatenate %0, %61, %0 in 1 : vector<8x4xf32>, vector<8x256xf32>, vector<8x4xf32> -> vector<8x264xf32>
    %63 = vector.extract_strided_slice %62 {offsets = [0, 0], sizes = [8, 256], strides = [1, 1]} : vector<8x264xf32> to vector<8x256xf32>
    %64 = vector.extract_strided_slice %62 {offsets = [0, 2], sizes = [8, 256], strides = [1, 1]} : vector<8x264xf32> to vector<8x256xf32>
    %65 = vector.extract_strided_slice %62 {offsets = [0, 4], sizes = [8, 256], strides = [1, 1]} : vector<8x264xf32> to vector<8x256xf32>
    %66 = vector.extract_strided_slice %62 {offsets = [0, 6], sizes = [8, 256], strides = [1, 1]} : vector<8x264xf32> to vector<8x256xf32>
    %67 = vector.extract_strided_slice %62 {offsets = [0, 8], sizes = [8, 256], strides = [1, 1]} : vector<8x264xf32> to vector<8x256xf32>
    %68 = tpu.concatenate %63, %64, %65, %66, %67 in 0 : vector<8x256xf32>, vector<8x256xf32>, vector<8x256xf32>, vector<8x256xf32>, vector<8x256xf32> -> vector<40x256xf32>
    %c4 = arith.constant 4 : index
    %c0_31 = arith.constant 0 : index
    %c0_32 = arith.constant 0 : index
    %69 = vector.load %arg2[%c4, %c0_31, %c0_32] : memref<16x8x40xf32, #tpu.memory_space<vmem>>, vector<1x8x40xf32>
    %70 = vector.shape_cast %69 : vector<1x8x40xf32> to vector<8x40xf32>
    %cst_33 = arith.constant dense<0.000000e+00> : vector<8x256xf32>
    %71 = tpu.matmul %70, %68, %cst_33 {dimension_numbers = #tpu.dot_dimension_numbers<[1], [0], [0], [1], [0, 0, 1, 1], [], []>} : vector<8x40xf32>, vector<40x256xf32>, vector<8x256xf32> -> vector<8x256xf32>
    %c4_34 = arith.constant 4 : index
    %c0_35 = arith.constant 0 : index
    %c0_36 = arith.constant 0 : index
    %72 = vector.load %arg3[%c4_34, %c0_35, %c0_36] : memref<16x8x1xf32, #tpu.memory_space<vmem>>, vector<1x8x1xf32>
    %73 = vector.shape_cast %72 : vector<1x8x1xf32> to vector<8x1xf32>
    %74 = vector.broadcast %73 : vector<8x1xf32> to vector<8x256xf32>
    %75 = arith.addf %71, %74 : vector<8x256xf32>
    %cst_37 = arith.constant 0.000000e+00 : f32
    %76 = vector.broadcast %cst_37 : f32 to vector<8x256xf32>
    %77 = arith.maximumf %75, %76 : vector<8x256xf32>
    %78 = tpu.concatenate %0, %77, %0 in 1 : vector<8x4xf32>, vector<8x256xf32>, vector<8x4xf32> -> vector<8x264xf32>
    %79 = vector.extract_strided_slice %78 {offsets = [0, 0], sizes = [8, 256], strides = [1, 1]} : vector<8x264xf32> to vector<8x256xf32>
    %80 = vector.extract_strided_slice %78 {offsets = [0, 2], sizes = [8, 256], strides = [1, 1]} : vector<8x264xf32> to vector<8x256xf32>
    %81 = vector.extract_strided_slice %78 {offsets = [0, 4], sizes = [8, 256], strides = [1, 1]} : vector<8x264xf32> to vector<8x256xf32>
    %82 = vector.extract_strided_slice %78 {offsets = [0, 6], sizes = [8, 256], strides = [1, 1]} : vector<8x264xf32> to vector<8x256xf32>
    %83 = vector.extract_strided_slice %78 {offsets = [0, 8], sizes = [8, 256], strides = [1, 1]} : vector<8x264xf32> to vector<8x256xf32>
    %84 = tpu.concatenate %79, %80, %81, %82, %83 in 0 : vector<8x256xf32>, vector<8x256xf32>, vector<8x256xf32>, vector<8x256xf32>, vector<8x256xf32> -> vector<40x256xf32>
    %c5 = arith.constant 5 : index
    %c0_38 = arith.constant 0 : index
    %c0_39 = arith.constant 0 : index
    %85 = vector.load %arg2[%c5, %c0_38, %c0_39] : memref<16x8x40xf32, #tpu.memory_space<vmem>>, vector<1x8x40xf32>
    %86 = vector.shape_cast %85 : vector<1x8x40xf32> to vector<8x40xf32>
    %cst_40 = arith.constant dense<0.000000e+00> : vector<8x256xf32>
    %87 = tpu.matmul %86, %84, %cst_40 {dimension_numbers = #tpu.dot_dimension_numbers<[1], [0], [0], [1], [0, 0, 1, 1], [], []>} : vector<8x40xf32>, vector<40x256xf32>, vector<8x256xf32> -> vector<8x256xf32>
    %c5_41 = arith.constant 5 : index
    %c0_42 = arith.constant 0 : index
    %c0_43 = arith.constant 0 : index
    %88 = vector.load %arg3[%c5_41, %c0_42, %c0_43] : memref<16x8x1xf32, #tpu.memory_space<vmem>>, vector<1x8x1xf32>
    %89 = vector.shape_cast %88 : vector<1x8x1xf32> to vector<8x1xf32>
    %90 = vector.broadcast %89 : vector<8x1xf32> to vector<8x256xf32>
    %91 = arith.addf %87, %90 : vector<8x256xf32>
    %cst_44 = arith.constant 0.000000e+00 : f32
    %92 = vector.broadcast %cst_44 : f32 to vector<8x256xf32>
    %93 = arith.maximumf %91, %92 : vector<8x256xf32>
    %94 = tpu.concatenate %0, %93, %0 in 1 : vector<8x4xf32>, vector<8x256xf32>, vector<8x4xf32> -> vector<8x264xf32>
    %95 = vector.extract_strided_slice %94 {offsets = [0, 0], sizes = [8, 256], strides = [1, 1]} : vector<8x264xf32> to vector<8x256xf32>
    %96 = vector.extract_strided_slice %94 {offsets = [0, 2], sizes = [8, 256], strides = [1, 1]} : vector<8x264xf32> to vector<8x256xf32>
    %97 = vector.extract_strided_slice %94 {offsets = [0, 4], sizes = [8, 256], strides = [1, 1]} : vector<8x264xf32> to vector<8x256xf32>
    %98 = vector.extract_strided_slice %94 {offsets = [0, 6], sizes = [8, 256], strides = [1, 1]} : vector<8x264xf32> to vector<8x256xf32>
    %99 = vector.extract_strided_slice %94 {offsets = [0, 8], sizes = [8, 256], strides = [1, 1]} : vector<8x264xf32> to vector<8x256xf32>
    %100 = tpu.concatenate %95, %96, %97, %98, %99 in 0 : vector<8x256xf32>, vector<8x256xf32>, vector<8x256xf32>, vector<8x256xf32>, vector<8x256xf32> -> vector<40x256xf32>
    %c6 = arith.constant 6 : index
    %c0_45 = arith.constant 0 : index
    %c0_46 = arith.constant 0 : index
    %101 = vector.load %arg2[%c6, %c0_45, %c0_46] : memref<16x8x40xf32, #tpu.memory_space<vmem>>, vector<1x8x40xf32>
    %102 = vector.shape_cast %101 : vector<1x8x40xf32> to vector<8x40xf32>
    %cst_47 = arith.constant dense<0.000000e+00> : vector<8x256xf32>
    %103 = tpu.matmul %102, %100, %cst_47 {dimension_numbers = #tpu.dot_dimension_numbers<[1], [0], [0], [1], [0, 0, 1, 1], [], []>} : vector<8x40xf32>, vector<40x256xf32>, vector<8x256xf32> -> vector<8x256xf32>
    %c6_48 = arith.constant 6 : index
    %c0_49 = arith.constant 0 : index
    %c0_50 = arith.constant 0 : index
    %104 = vector.load %arg3[%c6_48, %c0_49, %c0_50] : memref<16x8x1xf32, #tpu.memory_space<vmem>>, vector<1x8x1xf32>
    %105 = vector.shape_cast %104 : vector<1x8x1xf32> to vector<8x1xf32>
    %106 = vector.broadcast %105 : vector<8x1xf32> to vector<8x256xf32>
    %107 = arith.addf %103, %106 : vector<8x256xf32>
    %108 = arith.addf %107, %61 : vector<8x256xf32>
    %cst_51 = arith.constant 0.000000e+00 : f32
    %109 = vector.broadcast %cst_51 : f32 to vector<8x256xf32>
    %110 = arith.maximumf %108, %109 : vector<8x256xf32>
    %c7 = arith.constant 7 : index
    %c0_52 = arith.constant 0 : index
    %c0_53 = arith.constant 0 : index
    %111 = vector.load %arg2[%c7, %c0_52, %c0_53] : memref<16x8x40xf32, #tpu.memory_space<vmem>>, vector<1x8x40xf32>
    %112 = vector.shape_cast %111 : vector<1x8x40xf32> to vector<8x40xf32>
    %113 = vector.extract_strided_slice %112 {offsets = [0, 0], sizes = [8, 8], strides = [1, 1]} : vector<8x40xf32> to vector<8x8xf32>
    %cst_54 = arith.constant dense<0.000000e+00> : vector<8x256xf32>
    %114 = tpu.matmul %113, %110, %cst_54 {dimension_numbers = #tpu.dot_dimension_numbers<[1], [0], [0], [1], [0, 0, 1, 1], [], []>} : vector<8x8xf32>, vector<8x256xf32>, vector<8x256xf32> -> vector<8x256xf32>
    %c7_55 = arith.constant 7 : index
    %c0_56 = arith.constant 0 : index
    %c0_57 = arith.constant 0 : index
    %115 = vector.load %arg3[%c7_55, %c0_56, %c0_57] : memref<16x8x1xf32, #tpu.memory_space<vmem>>, vector<1x8x1xf32>
    %116 = vector.shape_cast %115 : vector<1x8x1xf32> to vector<8x1xf32>
    %117 = vector.broadcast %116 : vector<8x1xf32> to vector<8x256xf32>
    %118 = arith.addf %114, %117 : vector<8x256xf32>
    %cst_58 = arith.constant 0.000000e+00 : f32
    %119 = vector.broadcast %cst_58 : f32 to vector<8x256xf32>
    %120 = arith.maximumf %118, %119 : vector<8x256xf32>
    %121 = vector.extract_strided_slice %120 {offsets = [0, 0], sizes = [1, 256], strides = [1, 1]} : vector<8x256xf32> to vector<1x256xf32>
    %c0_59 = arith.constant 0 : index
    %c0_60 = arith.constant 0 : index
    %c0_61 = arith.constant 0 : index
    %122 = vector.load %arg4[%c0_59, %c0_60, %c0_61] : memref<1x1x256xf32, #tpu.memory_space<vmem>>, vector<1x1x256xf32>
    %123 = vector.shape_cast %122 : vector<1x1x256xf32> to vector<1x256xf32>
    %124 = vector.shape_cast %121 : vector<1x256xf32> to vector<1x1x256xf32>
    tpu.vector_store %arg4[%c0_59, %c0_60, %c0_61], %124 {strides = array<i32>} : memref<1x1x256xf32, #tpu.memory_space<vmem>>, vector<1x1x256xf32>,
    %c11 = arith.constant 11 : index
    %c0_62 = arith.constant 0 : index
    %c0_63 = arith.constant 0 : index
    %125 = vector.load %arg2[%c11, %c0_62, %c0_63] : memref<16x8x40xf32, #tpu.memory_space<vmem>>, vector<1x8x40xf32>
    %126 = vector.shape_cast %125 : vector<1x8x40xf32> to vector<8x40xf32>
    %127 = vector.extract_strided_slice %126 {offsets = [0, 0], sizes = [8, 8], strides = [1, 1]} : vector<8x40xf32> to vector<8x8xf32>
    %cst_64 = arith.constant dense<0.000000e+00> : vector<8x256xf32>
    %128 = tpu.matmul %127, %120, %cst_64 {dimension_numbers = #tpu.dot_dimension_numbers<[1], [0], [0], [1], [0, 0, 1, 1], [], []>} : vector<8x8xf32>, vector<8x256xf32>, vector<8x256xf32> -> vector<8x256xf32>
    %c11_65 = arith.constant 11 : index
    %c0_66 = arith.constant 0 : index
    %c0_67 = arith.constant 0 : index
    %129 = vector.load %arg3[%c11_65, %c0_66, %c0_67] : memref<16x8x1xf32, #tpu.memory_space<vmem>>, vector<1x8x1xf32>
    %130 = vector.shape_cast %129 : vector<1x8x1xf32> to vector<8x1xf32>
    %131 = vector.broadcast %130 : vector<8x1xf32> to vector<8x256xf32>
    %132 = arith.addf %128, %131 : vector<8x256xf32>
    %133 = tpu.concatenate %0, %120, %0 in 1 : vector<8x4xf32>, vector<8x256xf32>, vector<8x4xf32> -> vector<8x264xf32>
    %134 = vector.extract_strided_slice %133 {offsets = [0, 0], sizes = [8, 256], strides = [1, 1]} : vector<8x264xf32> to vector<8x256xf32>
    %135 = vector.extract_strided_slice %133 {offsets = [0, 2], sizes = [8, 256], strides = [1, 1]} : vector<8x264xf32> to vector<8x256xf32>
    %136 = vector.extract_strided_slice %133 {offsets = [0, 4], sizes = [8, 256], strides = [1, 1]} : vector<8x264xf32> to vector<8x256xf32>
    %137 = vector.extract_strided_slice %133 {offsets = [0, 6], sizes = [8, 256], strides = [1, 1]} : vector<8x264xf32> to vector<8x256xf32>
    %138 = vector.extract_strided_slice %133 {offsets = [0, 8], sizes = [8, 256], strides = [1, 1]} : vector<8x264xf32> to vector<8x256xf32>
    %139 = tpu.concatenate %134, %135, %136, %137, %138 in 0 : vector<8x256xf32>, vector<8x256xf32>, vector<8x256xf32>, vector<8x256xf32>, vector<8x256xf32> -> vector<40x256xf32>
    %c8 = arith.constant 8 : index
    %c0_68 = arith.constant 0 : index
    %c0_69 = arith.constant 0 : index
    %140 = vector.load %arg2[%c8, %c0_68, %c0_69] : memref<16x8x40xf32, #tpu.memory_space<vmem>>, vector<1x8x40xf32>
    %141 = vector.shape_cast %140 : vector<1x8x40xf32> to vector<8x40xf32>
    %cst_70 = arith.constant dense<0.000000e+00> : vector<8x256xf32>
    %142 = tpu.matmul %141, %139, %cst_70 {dimension_numbers = #tpu.dot_dimension_numbers<[1], [0], [0], [1], [0, 0, 1, 1], [], []>} : vector<8x40xf32>, vector<40x256xf32>, vector<8x256xf32> -> vector<8x256xf32>
    %c8_71 = arith.constant 8 : index
    %c0_72 = arith.constant 0 : index
    %c0_73 = arith.constant 0 : index
    %143 = vector.load %arg3[%c8_71, %c0_72, %c0_73] : memref<16x8x1xf32, #tpu.memory_space<vmem>>, vector<1x8x1xf32>
    %144 = vector.shape_cast %143 : vector<1x8x1xf32> to vector<8x1xf32>
    %145 = vector.broadcast %144 : vector<8x1xf32> to vector<8x256xf32>
    %146 = arith.addf %142, %145 : vector<8x256xf32>
    %cst_74 = arith.constant 0.000000e+00 : f32
    %147 = vector.broadcast %cst_74 : f32 to vector<8x256xf32>
    %148 = arith.maximumf %146, %147 : vector<8x256xf32>
    %149 = tpu.concatenate %0, %148, %0 in 1 : vector<8x4xf32>, vector<8x256xf32>, vector<8x4xf32> -> vector<8x264xf32>
    %150 = vector.extract_strided_slice %149 {offsets = [0, 0], sizes = [8, 256], strides = [1, 1]} : vector<8x264xf32> to vector<8x256xf32>
    %151 = vector.extract_strided_slice %149 {offsets = [0, 2], sizes = [8, 256], strides = [1, 1]} : vector<8x264xf32> to vector<8x256xf32>
    %152 = vector.extract_strided_slice %149 {offsets = [0, 4], sizes = [8, 256], strides = [1, 1]} : vector<8x264xf32> to vector<8x256xf32>
    %153 = vector.extract_strided_slice %149 {offsets = [0, 6], sizes = [8, 256], strides = [1, 1]} : vector<8x264xf32> to vector<8x256xf32>
    %154 = vector.extract_strided_slice %149 {offsets = [0, 8], sizes = [8, 256], strides = [1, 1]} : vector<8x264xf32> to vector<8x256xf32>
    %155 = tpu.concatenate %150, %151, %152, %153, %154 in 0 : vector<8x256xf32>, vector<8x256xf32>, vector<8x256xf32>, vector<8x256xf32>, vector<8x256xf32> -> vector<40x256xf32>
    %c9 = arith.constant 9 : index
    %c0_75 = arith.constant 0 : index
    %c0_76 = arith.constant 0 : index
    %156 = vector.load %arg2[%c9, %c0_75, %c0_76] : memref<16x8x40xf32, #tpu.memory_space<vmem>>, vector<1x8x40xf32>
    %157 = vector.shape_cast %156 : vector<1x8x40xf32> to vector<8x40xf32>
    %cst_77 = arith.constant dense<0.000000e+00> : vector<8x256xf32>
    %158 = tpu.matmul %157, %155, %cst_77 {dimension_numbers = #tpu.dot_dimension_numbers<[1], [0], [0], [1], [0, 0, 1, 1], [], []>} : vector<8x40xf32>, vector<40x256xf32>, vector<8x256xf32> -> vector<8x256xf32>
    %c9_78 = arith.constant 9 : index
    %c0_79 = arith.constant 0 : index
    %c0_80 = arith.constant 0 : index
    %159 = vector.load %arg3[%c9_78, %c0_79, %c0_80] : memref<16x8x1xf32, #tpu.memory_space<vmem>>, vector<1x8x1xf32>
    %160 = vector.shape_cast %159 : vector<1x8x1xf32> to vector<8x1xf32>
    %161 = vector.broadcast %160 : vector<8x1xf32> to vector<8x256xf32>
    %162 = arith.addf %158, %161 : vector<8x256xf32>
    %cst_81 = arith.constant 0.000000e+00 : f32
    %163 = vector.broadcast %cst_81 : f32 to vector<8x256xf32>
    %164 = arith.maximumf %162, %163 : vector<8x256xf32>
    %165 = tpu.concatenate %0, %164, %0 in 1 : vector<8x4xf32>, vector<8x256xf32>, vector<8x4xf32> -> vector<8x264xf32>
    %166 = vector.extract_strided_slice %165 {offsets = [0, 0], sizes = [8, 256], strides = [1, 1]} : vector<8x264xf32> to vector<8x256xf32>
    %167 = vector.extract_strided_slice %165 {offsets = [0, 2], sizes = [8, 256], strides = [1, 1]} : vector<8x264xf32> to vector<8x256xf32>
    %168 = vector.extract_strided_slice %165 {offsets = [0, 4], sizes = [8, 256], strides = [1, 1]} : vector<8x264xf32> to vector<8x256xf32>
    %169 = vector.extract_strided_slice %165 {offsets = [0, 6], sizes = [8, 256], strides = [1, 1]} : vector<8x264xf32> to vector<8x256xf32>
    %170 = vector.extract_strided_slice %165 {offsets = [0, 8], sizes = [8, 256], strides = [1, 1]} : vector<8x264xf32> to vector<8x256xf32>
    %171 = tpu.concatenate %166, %167, %168, %169, %170 in 0 : vector<8x256xf32>, vector<8x256xf32>, vector<8x256xf32>, vector<8x256xf32>, vector<8x256xf32> -> vector<40x256xf32>
    %c10 = arith.constant 10 : index
    %c0_82 = arith.constant 0 : index
    %c0_83 = arith.constant 0 : index
    %172 = vector.load %arg2[%c10, %c0_82, %c0_83] : memref<16x8x40xf32, #tpu.memory_space<vmem>>, vector<1x8x40xf32>
    %173 = vector.shape_cast %172 : vector<1x8x40xf32> to vector<8x40xf32>
    %cst_84 = arith.constant dense<0.000000e+00> : vector<8x256xf32>
    %174 = tpu.matmul %173, %171, %cst_84 {dimension_numbers = #tpu.dot_dimension_numbers<[1], [0], [0], [1], [0, 0, 1, 1], [], []>} : vector<8x40xf32>, vector<40x256xf32>, vector<8x256xf32> -> vector<8x256xf32>
    %c10_85 = arith.constant 10 : index
    %c0_86 = arith.constant 0 : index
    %c0_87 = arith.constant 0 : index
    %175 = vector.load %arg3[%c10_85, %c0_86, %c0_87] : memref<16x8x1xf32, #tpu.memory_space<vmem>>, vector<1x8x1xf32>
    %176 = vector.shape_cast %175 : vector<1x8x1xf32> to vector<8x1xf32>
    %177 = vector.broadcast %176 : vector<8x1xf32> to vector<8x256xf32>
    %178 = arith.addf %174, %177 : vector<8x256xf32>
    %179 = arith.addf %178, %132 : vector<8x256xf32>
    %cst_88 = arith.constant 0.000000e+00 : f32
    %180 = vector.broadcast %cst_88 : f32 to vector<8x256xf32>
    %181 = arith.maximumf %179, %180 : vector<8x256xf32>
    %182 = tpu.concatenate %0, %181, %0 in 1 : vector<8x4xf32>, vector<8x256xf32>, vector<8x4xf32> -> vector<8x264xf32>
    %183 = vector.extract_strided_slice %182 {offsets = [0, 0], sizes = [8, 256], strides = [1, 1]} : vector<8x264xf32> to vector<8x256xf32>
    %184 = vector.extract_strided_slice %182 {offsets = [0, 2], sizes = [8, 256], strides = [1, 1]} : vector<8x264xf32> to vector<8x256xf32>
    %185 = vector.extract_strided_slice %182 {offsets = [0, 4], sizes = [8, 256], strides = [1, 1]} : vector<8x264xf32> to vector<8x256xf32>
    %186 = vector.extract_strided_slice %182 {offsets = [0, 6], sizes = [8, 256], strides = [1, 1]} : vector<8x264xf32> to vector<8x256xf32>
    %187 = vector.extract_strided_slice %182 {offsets = [0, 8], sizes = [8, 256], strides = [1, 1]} : vector<8x264xf32> to vector<8x256xf32>
    %188 = tpu.concatenate %183, %184, %185, %186, %187 in 0 : vector<8x256xf32>, vector<8x256xf32>, vector<8x256xf32>, vector<8x256xf32>, vector<8x256xf32> -> vector<40x256xf32>
    %c12 = arith.constant 12 : index
    %c0_89 = arith.constant 0 : index
    %c0_90 = arith.constant 0 : index
    %189 = vector.load %arg2[%c12, %c0_89, %c0_90] : memref<16x8x40xf32, #tpu.memory_space<vmem>>, vector<1x8x40xf32>
    %190 = vector.shape_cast %189 : vector<1x8x40xf32> to vector<8x40xf32>
    %cst_91 = arith.constant dense<0.000000e+00> : vector<8x256xf32>
    %191 = tpu.matmul %190, %188, %cst_91 {dimension_numbers = #tpu.dot_dimension_numbers<[1], [0], [0], [1], [0, 0, 1, 1], [], []>} : vector<8x40xf32>, vector<40x256xf32>, vector<8x256xf32> -> vector<8x256xf32>
    %c12_92 = arith.constant 12 : index
    %c0_93 = arith.constant 0 : index
    %c0_94 = arith.constant 0 : index
    %192 = vector.load %arg3[%c12_92, %c0_93, %c0_94] : memref<16x8x1xf32, #tpu.memory_space<vmem>>, vector<1x8x1xf32>
    %193 = vector.shape_cast %192 : vector<1x8x1xf32> to vector<8x1xf32>
    %194 = vector.broadcast %193 : vector<8x1xf32> to vector<8x256xf32>
    %195 = arith.addf %191, %194 : vector<8x256xf32>
    %cst_95 = arith.constant 0.000000e+00 : f32
    %196 = vector.broadcast %cst_95 : f32 to vector<8x256xf32>
    %197 = arith.maximumf %195, %196 : vector<8x256xf32>
    %198 = tpu.concatenate %0, %197, %0 in 1 : vector<8x4xf32>, vector<8x256xf32>, vector<8x4xf32> -> vector<8x264xf32>
    %199 = vector.extract_strided_slice %198 {offsets = [0, 0], sizes = [8, 256], strides = [1, 1]} : vector<8x264xf32> to vector<8x256xf32>
    %200 = vector.extract_strided_slice %198 {offsets = [0, 2], sizes = [8, 256], strides = [1, 1]} : vector<8x264xf32> to vector<8x256xf32>
    %201 = vector.extract_strided_slice %198 {offsets = [0, 4], sizes = [8, 256], strides = [1, 1]} : vector<8x264xf32> to vector<8x256xf32>
    %202 = vector.extract_strided_slice %198 {offsets = [0, 6], sizes = [8, 256], strides = [1, 1]} : vector<8x264xf32> to vector<8x256xf32>
    %203 = vector.extract_strided_slice %198 {offsets = [0, 8], sizes = [8, 256], strides = [1, 1]} : vector<8x264xf32> to vector<8x256xf32>
    %204 = tpu.concatenate %199, %200, %201, %202, %203 in 0 : vector<8x256xf32>, vector<8x256xf32>, vector<8x256xf32>, vector<8x256xf32>, vector<8x256xf32> -> vector<40x256xf32>
    %c13 = arith.constant 13 : index
    %c0_96 = arith.constant 0 : index
    %c0_97 = arith.constant 0 : index
    %205 = vector.load %arg2[%c13, %c0_96, %c0_97] : memref<16x8x40xf32, #tpu.memory_space<vmem>>, vector<1x8x40xf32>
    %206 = vector.shape_cast %205 : vector<1x8x40xf32> to vector<8x40xf32>
    %cst_98 = arith.constant dense<0.000000e+00> : vector<8x256xf32>
    %207 = tpu.matmul %206, %204, %cst_98 {dimension_numbers = #tpu.dot_dimension_numbers<[1], [0], [0], [1], [0, 0, 1, 1], [], []>} : vector<8x40xf32>, vector<40x256xf32>, vector<8x256xf32> -> vector<8x256xf32>
    %c13_99 = arith.constant 13 : index
    %c0_100 = arith.constant 0 : index
    %c0_101 = arith.constant 0 : index
    %208 = vector.load %arg3[%c13_99, %c0_100, %c0_101] : memref<16x8x1xf32, #tpu.memory_space<vmem>>, vector<1x8x1xf32>
    %209 = vector.shape_cast %208 : vector<1x8x1xf32> to vector<8x1xf32>
    %210 = vector.broadcast %209 : vector<8x1xf32> to vector<8x256xf32>
    %211 = arith.addf %207, %210 : vector<8x256xf32>
    %cst_102 = arith.constant 0.000000e+00 : f32
    %212 = vector.broadcast %cst_102 : f32 to vector<8x256xf32>
    %213 = arith.maximumf %211, %212 : vector<8x256xf32>
    %214 = tpu.concatenate %0, %213, %0 in 1 : vector<8x4xf32>, vector<8x256xf32>, vector<8x4xf32> -> vector<8x264xf32>
    %215 = vector.extract_strided_slice %214 {offsets = [0, 0], sizes = [8, 256], strides = [1, 1]} : vector<8x264xf32> to vector<8x256xf32>
    %216 = vector.extract_strided_slice %214 {offsets = [0, 2], sizes = [8, 256], strides = [1, 1]} : vector<8x264xf32> to vector<8x256xf32>
    %217 = vector.extract_strided_slice %214 {offsets = [0, 4], sizes = [8, 256], strides = [1, 1]} : vector<8x264xf32> to vector<8x256xf32>
    %218 = vector.extract_strided_slice %214 {offsets = [0, 6], sizes = [8, 256], strides = [1, 1]} : vector<8x264xf32> to vector<8x256xf32>
    %219 = vector.extract_strided_slice %214 {offsets = [0, 8], sizes = [8, 256], strides = [1, 1]} : vector<8x264xf32> to vector<8x256xf32>
    %220 = tpu.concatenate %215, %216, %217, %218, %219 in 0 : vector<8x256xf32>, vector<8x256xf32>, vector<8x256xf32>, vector<8x256xf32>, vector<8x256xf32> -> vector<40x256xf32>
    %c14 = arith.constant 14 : index
    %c0_103 = arith.constant 0 : index
    %c0_104 = arith.constant 0 : index
    %221 = vector.load %arg2[%c14, %c0_103, %c0_104] : memref<16x8x40xf32, #tpu.memory_space<vmem>>, vector<1x8x40xf32>
    %222 = vector.shape_cast %221 : vector<1x8x40xf32> to vector<8x40xf32>
    %cst_105 = arith.constant dense<0.000000e+00> : vector<8x256xf32>
    %223 = tpu.matmul %222, %220, %cst_105 {dimension_numbers = #tpu.dot_dimension_numbers<[1], [0], [0], [1], [0, 0, 1, 1], [], []>} : vector<8x40xf32>, vector<40x256xf32>, vector<8x256xf32> -> vector<8x256xf32>
    %c14_106 = arith.constant 14 : index
    %c0_107 = arith.constant 0 : index
    %c0_108 = arith.constant 0 : index
    %224 = vector.load %arg3[%c14_106, %c0_107, %c0_108] : memref<16x8x1xf32, #tpu.memory_space<vmem>>, vector<1x8x1xf32>
    %225 = vector.shape_cast %224 : vector<1x8x1xf32> to vector<8x1xf32>
    %226 = vector.broadcast %225 : vector<8x1xf32> to vector<8x256xf32>
    %227 = arith.addf %223, %226 : vector<8x256xf32>
    %228 = arith.addf %227, %181 : vector<8x256xf32>
    %cst_109 = arith.constant 0.000000e+00 : f32
    %229 = vector.broadcast %cst_109 : f32 to vector<8x256xf32>
    %230 = arith.maximumf %228, %229 : vector<8x256xf32>
    %c15 = arith.constant 15 : index
    %c0_110 = arith.constant 0 : index
    %c0_111 = arith.constant 0 : index
    %231 = vector.load %arg2[%c15, %c0_110, %c0_111] : memref<16x8x40xf32, #tpu.memory_space<vmem>>, vector<1x8x40xf32>
    %232 = vector.shape_cast %231 : vector<1x8x40xf32> to vector<8x40xf32>
    %233 = vector.extract_strided_slice %232 {offsets = [0, 0], sizes = [8, 8], strides = [1, 1]} : vector<8x40xf32> to vector<8x8xf32>
    %cst_112 = arith.constant dense<0.000000e+00> : vector<8x256xf32>
    %234 = tpu.matmul %233, %230, %cst_112 {dimension_numbers = #tpu.dot_dimension_numbers<[1], [0], [0], [1], [0, 0, 1, 1], [], []>} : vector<8x8xf32>, vector<8x256xf32>, vector<8x256xf32> -> vector<8x256xf32>
    %c15_113 = arith.constant 15 : index
    %c0_114 = arith.constant 0 : index
    %c0_115 = arith.constant 0 : index
    %235 = vector.load %arg3[%c15_113, %c0_114, %c0_115] : memref<16x8x1xf32, #tpu.memory_space<vmem>>, vector<1x8x1xf32>
    %236 = vector.shape_cast %235 : vector<1x8x1xf32> to vector<8x1xf32>
    %237 = vector.broadcast %236 : vector<8x1xf32> to vector<8x256xf32>
    %238 = arith.addf %234, %237 : vector<8x256xf32>
    %239 = vector.extract_strided_slice %238 {offsets = [0, 0], sizes = [1, 256], strides = [1, 1]} : vector<8x256xf32> to vector<1x256xf32>
    %cst_116 = arith.constant 0.000000e+00 : f32
    %240 = vector.broadcast %cst_116 : f32 to vector<1x256xf32>
    %241 = arith.subf %240, %239 : vector<1x256xf32>
    %242 = math.exp %241 : vector<1x256xf32>
    %cst_117 = arith.constant 1.000000e+00 : f32
    %243 = vector.broadcast %cst_117 : f32 to vector<1x256xf32>
    %244 = arith.addf %243, %242 : vector<1x256xf32>
    %cst_118 = arith.constant 1.000000e+00 : f32
    %245 = vector.broadcast %cst_118 : f32 to vector<1x256xf32>
    %246 = arith.divf %245, %244 : vector<1x256xf32>
    %c0_119 = arith.constant 0 : index
    %c0_120 = arith.constant 0 : index
    %c0_121 = arith.constant 0 : index
    %247 = vector.load %arg5[%c0_119, %c0_120, %c0_121] : memref<1x1x256xf32, #tpu.memory_space<vmem>>, vector<1x1x256xf32>
    %248 = vector.shape_cast %247 : vector<1x1x256xf32> to vector<1x256xf32>
    %249 = vector.shape_cast %246 : vector<1x256xf32> to vector<1x1x256xf32>
    tpu.vector_store %arg5[%c0_119, %c0_120, %c0_121], %249 {strides = array<i32>} : memref<1x1x256xf32, #tpu.memory_space<vmem>>, vector<1x1x256xf32>,
    return
  }
  func.func @transform_0(%arg0: i32) -> (i32, i32, i32) {
    %c0_i32 = arith.constant 0 : i32
    %c0_i32_0 = arith.constant 0 : i32
    %c0_i32_1 = arith.constant 0 : i32
    return %arg0, %c0_i32, %c0_i32_0 : i32, i32, i32
  }
  func.func @transform_1(%arg0: i32) -> (i32, i32, i32) {
    %c0_i32 = arith.constant 0 : i32
    %c0_i32_0 = arith.constant 0 : i32
    %c0_i32_1 = arith.constant 0 : i32
    %c0_i32_2 = arith.constant 0 : i32
    return %c0_i32, %c0_i32_0, %c0_i32_1 : i32, i32, i32
  }
  func.func @transform_2(%arg0: i32) -> (i32, i32, i32) {
    %c0_i32 = arith.constant 0 : i32
    %c0_i32_0 = arith.constant 0 : i32
    %c0_i32_1 = arith.constant 0 : i32
    %c0_i32_2 = arith.constant 0 : i32
    return %c0_i32, %c0_i32_0, %c0_i32_1 : i32, i32, i32
  }
  func.func @transform_3(%arg0: i32) -> (i32, i32, i32) {
    %c0_i32 = arith.constant 0 : i32
    %c0_i32_0 = arith.constant 0 : i32
    %c0_i32_1 = arith.constant 0 : i32
    return %arg0, %c0_i32, %c0_i32_0 : i32, i32, i32
  }
  func.func @transform_4(%arg0: i32) -> (i32, i32, i32) {
    %c0_i32 = arith.constant 0 : i32
    %c0_i32_0 = arith.constant 0 : i32
    %c0_i32_1 = arith.constant 0 : i32
    return %arg0, %c0_i32, %c0_i32_0 : i32, i32, i32
  }
}

</mosaic_0001>

<bundles_post_ra>
// kernel: _lambda_.1
= control target key start
LH: loop header
LB: loop body
LE: loop exit
PB: predicated region body
PF: predicated region fallthrough
CT: control target
= control target key end

     0   :  { %10 = vsyncpa [#allocation3], 0  ;;  %s2997_s0 = inlined_call_operand.hbm [shape: f32[2,1,256], index: 0, kind: input, shape index: {}]   ;;  %s2998_s1 = inlined_call_operand.hbm [shape: f32[16,8,40], index: 1, kind: input, shape index: {}]   ;;  %s2999_s2 = inlined_call_operand.hbm [shape: f32[16,8,1], index: 2, kind: input, shape index: {}]   ;;  %s3000_s3 = inlined_call_operand.vmem [shape: f32[2,1,256], index: 3, kind: output, shape index: {0}]   ;;  %s3001_s4 = inlined_call_operand.vmem [shape: f32[2,1,256], index: 4, kind: output, shape index: {1}]  }
   0x1   :  { %12 = vsyncpa [#allocation3 + $0x1], 0 }
   0x2   :  { %13 = vsyncpa [#allocation5], 0  ;;  %s2511_s15 = smov 0   ;;  %s2513_s16 = smov 0  }
   0x3   :  { %s2515_s17 = smov 0   ;;  %s2517_s18 = smov 0  }
   0x4 LB: > { %s155_s21 = sshll.u32 %s2998_s1, 4  ;;  %s2535_s22 = sadd.s32 4294967295, %s2474_s18   ;;  %s2474_s18 = sphi %s2517_s18, %s3012_s18   ;;  %s2470_s17 = sphi %s2515_s17, %s3011_s17   ;;  %s2466_s16 = sphi %s2513_s16, %s3010_s16   ;;  %s2462_s15 = sphi %s2511_s15, %s3009_s15   ;;  %s156_s21 = int_to_ptr.hbm [resolvable:$true] %s155_s21 }
   0x5   : > { %p1955_p0 = scmp.ge.s32.totalorder %s2474_s18, 1  ;;  %p40_p1 = scmp.eq.s32.totalorder %s2535_s22, 0 }
   0x6   : > { %p144_p2 = scmp.lt.s32.totalorder %s2474_s18, 3  ;;  %s2476_s24 = smov [#allocation4]  }
   0x7   : > { %s157_s25 = sshll.u32 %s2476_s24, 4  ;;  %s169_s28 = sshll.u32 %s2999_s2, 4  ;;  %s158_s25 = int_to_ptr.vmem [resolvable:$true] %s157_s25  ;;  %s170_s28 = int_to_ptr.hbm [resolvable:$true] %s169_s28 }
   0x8   : > { %p2540_p3 = pnand %p1955_p0, %p144_p2  ;;  %s2477_s29 = smov [#allocation6]  }
   0x9   : > { %s171_s30 = sshll.u32 %s2477_s29, 4  ;;  %s2478_s5 = smov 128   ;;  %s172_s30 = int_to_ptr.vmem [resolvable:$true] %s171_s30 }
   0xa   : > { %p2037_p4 = pneg %p2540_p3  ;;  %s2479_s6 = smov 8  }
   0xb   : > { %s2552_s7 = sadd.s32 1, %s2474_s18   ;;  %s26_s9 = sadd.s32 1, %s2470_s17 }
   0xc   : > { %p2038_p5 = pnand %p2037_p4, %p40_p1  ;;  %s23_s8 = ssub.s32 %s2474_s18, %s2552_s7 }
   0xd   : > { %p24_p6 = scmp.eq.s32.totalorder %s23_s8, 0  ;;  %p33_p7 = scmp.ne.s32.totalorder %s2470_s17, %s2466_s16 }
   0xe   : > { %2040 = dma.hbm_to_vmem [thread:$0]  (!%p2038_p5), %s156_s21, 2048, %s158_s25, [#allocation5], %s2478_s5, %s2478_s5, %s2479_s6  }
   0xf   : > { %2043 = dma.hbm_to_vmem [thread:$0]  (!%p2038_p5), %s170_s28, 2048, %s172_s30, [#allocation5], %s2478_s5, %s2478_s5, %s2479_s6  }
  0x10   : > { %p34_p8 = scmp.eq.s32.totalorder %s2474_s18, 0  ;;  %p39_p9 = scmp.ne.s32.totalorder %s2466_s16, %s2462_s15 }
  0x11   : > { %s2563_s10 = scalar_select %p24_p6, %s2470_s17, %s26_s9  }
  0x12   : > { %p2567_p10 = por %p40_p1, %p39_p9  ;;  %p2050_p11 = scmp.lt.s32.totalorder %s2474_s18, 2 }
  0x13   : > { %s185_s12 = sand.u32 1, %s2470_s17   ;;  %s1960_s13 = sshll.u32 %s2474_s18, 1 }
  0x14   : > { %p35_p12 = por %p34_p8, %p33_p7  ;;  %s1959_s14 = sshll.u32 %s185_s12, 1 }
  0x15   : > { %s193_s21 = scalar_lea.hbm %s2997_s0, %s1960_s13  ;;  %s189_s25 = scalar_lea.vmem [#allocation2], %s1959_s14 }
  0x16   : > { %s195_s24 = sshll.u32 %s193_s21, 4  ;;  %s197_s26 = sshll.u32 %s189_s25, 4  ;;  %s196_s24 = int_to_ptr.hbm [resolvable:$true] %s195_s24  ;;  %s198_s26 = int_to_ptr.vmem [resolvable:$true] %s197_s26 }
  0x17   : > { %p2577_p13 = pnand %p2050_p11, %p35_p12  ;;  %s186_s27 = scalar_lea.sflag [#allocation3], %s185_s12 }
  0x18   : > { %s2406_s28 = sshra.s32 %s196_s24, 4  ;;  %s2413_s5 = scalar_lea.hbm %s2997_s0, 4  ;;  %s2407_s28 = int_to_ptr.hbm [resolvable:$true] %s2406_s28 }
  0x19   : > { %s2408_s18 = scalar_lea.hbm %s2407_s28, 2  ;;  %p2410_p2 = pneg %p2577_p13 }
  0x1a   : > { %p2409_p0 = scmp.ne.s32.totalorder %s2407_s28, %s2408_s18  ;;  %p2414_p6 = scmp.lt.s32.totalorder %s2407_s28, %s2997_s0 }
  0x1b   : > { %p2415_p7 = scmp.lt.s32.totalorder %s2413_s5, %s2408_s18 }
  0x1c   : > { %p2411_p4 = pnand %p2410_p2, %p2409_p0 }
  0x1d   : > { %p2416_p8 = por %p2415_p7, %p2414_p6 }
  0x1e   : > { %p2412_p5 = pneg %p2411_p4 }
  0x20   : > { %p2417_p9 = pnand %p2416_p8, %p2412_p5 }
  0x22   : > { %2420 = shalt.err (!%p2417_p9)
}
  0x23   : > { %2047 = dma.hbm_to_vmem [thread:$0]  (!%p2577_p13), %s196_s24, 32, %s198_s26, %s186_s27  }
  0x24   : > { %206 = sbr.rel (%p2540_p3) target bundleno = 5018 (0x139a), region = 32  ;;  %s208_s9 = sand.u32 (!%p2540_p3), 1, %s2466_s16  }
  0x25   : > { %s1962_s12 = sshll.u32 (!%p2540_p3), %s208_s9, 1  ;;  %s209_s13 = scalar_lea.sflag (!%p2540_p3), [#allocation3], %s208_s9 }
  0x26   : > { %s212_s14 = scalar_lea.vmem (!%p2540_p3), [#allocation2], %s1962_s12 }
  0x29   : > { %2453 = dma.done.wait (%p2567_p10), %s209_s13, 32  }
  0x2a   : > { %2455 = vsyncadd (%p2567_p10), %s209_s13, 4294967264 }
  0x2b   : > { %2457 = dma.done.wait (%p40_p1), [#allocation5], 4096  }
  0x2c   : > { %2459 = vsyncadd (%p40_p1), [#allocation5], 4294963200  ;;  %v259_v0 = vld [vmem:[%s212_s14] sm:$0x3]  ;;  %vm265_vm0 = vcmask 1040384   ;;  %s2480_s23 = smov 4  }
  0x2d   : > { %v261_v1 = vperm.slane %v259_v0, 0  ;;  %v262_v2 = vperm.slane %v259_v0, 1  ;;  %vm327_vm1 = vcmask 31744   ;;  %s2481_s11 = smov 124   ;;  %s2482_s19 = smov 122   ;;  %v381_v12 = vld [vmem:[#allocation6] sm:$0xff] }
  0x2e   : > { %s2483_s20 = smov 120   ;;  %s2484_s21 = smov 126   ;;  %v2485_v14 = vmov 0   ;;  %vm375_vm2 = vcmask 982016   ;;  %vm364_vm3 = vcmask 998400   ;;  %vm353_vm4 = vcmask 1014784   ;;  %vm2625_vm6 = vmneg %vm327_vm1 }
  0x2f   : > { %v266_v3 = vsel %vm265_vm0, %v261_v1, 0.0  ;;  %1967 = vmatpush.msk.msra.mxu0 %vm265_vm0, %v261_v1  ;;  %1969 = vmatpush.msk.msra.mxu1 %vm265_vm0, %v262_v2  ;;  %v267_v4 = vsel %vm265_vm0, %v262_v2, 0.0  ;;  %vm342_vm5 = vcmask 1031168   ;;  %v380_v33 = vld [vmem:[#allocation4] sm:$0xff]  ;;  %vm387_vm7 = vcmask 326656   ;;  %v269_v52 = vld [vmem:[#allocation4 + $0x18] sm:$0xff] }
  0x30   : > { %323 = vrot.lane.b32.xlu0 %v266_v3, %s2480_s23  ;;  %2115 = vset.pattern.permute.xlu1 %v2485_v14  ;;  %vm277_vm8 = vcmask 64512   ;;  %v490_v54 = vld [vmem:[#allocation6 + $0x8] sm:$0xff]  ;;  %p251_p1 = scmp.lt.s32.totalorder %s2535_s22, 1 }
  0x31   : > { %2136 = vset.pattern.permute.xlu0 %v2485_v14  ;;  %2197 = vset.pattern.permute.xlu2 %v2485_v14  ;;  %v488_v14 = vld [vmem:[#allocation4 + $0x8] sm:$0xff] }
  0x32   : > { %1968 = vmatmul.msk.f32.vlgmr.msra.gmra.mxu0 %vm277_vm8, %v269_v52  ;;  %1970 = vmatmul.msk.f32.vlgmr.msra.gmra.mxu1 %vm277_vm8, %v269_v52  ;;  %s3014_s22 = smov (!%p251_p1, %s2535_s22), 1 }
  0x33   : > { %s1965_s24 = sshll.u32 %s3014_s22, 1 }
  0x34   : > { %s254_s15 = scalar_lea.vmem %s3000_s3, %s1965_s24  ;;  %s258_s18 = scalar_lea.vmem %s3001_s4, %s1965_s24 }
  0x38   : > { %325 = vrot.lane.b32.xlu0 %v267_v4, %s2480_s23 }
  0xa2   : > { %v324_v5 = vpop.permute.xlu0 %323 }
  0xa3   : > { %v332_v7 = vsel %vm327_vm1, 0.0, %v324_v5 }
  0xaa   : > { %v326_v6 = vpop.permute.xlu0 %325 }
  0xab   : > { %v328_v8 = vsel %vm327_vm1, %v324_v5, %v326_v6  ;;  %v333_v10 = vsel %vm327_vm1, %v326_v6, 0.0 }
  0xac   : > { %v2105_v9 = vpack.i.bf16 %v328_v8, %v332_v7 }
  0xae   : > { %2106 = vrot.lane.b32.xlu0 %v2105_v9, %s2481_s11  ;;  %2101 = vrot.lane.b32.xlu2 %v2105_v9, %s2482_s19 }
  0xaf   : > { %2096 = vrot.lane.b32.xlu1 %v2105_v9, %s2483_s20 }
  0xb6   : > { %340 = vrot.lane.b32.xlu0 %v333_v10, %s2484_s21  ;;  %362 = vrot.lane.b32.xlu2 %v333_v10, %s2482_s19 }
  0xb7   : > { %373 = vrot.lane.b32.xlu1 %v333_v10, %s2483_s20 }
  0xbe   : > { %2111 = vrot.lane.b32.xlu2 %v2105_v9, %s2484_s21 }
  0xbf   : > { %351 = vrot.lane.b32.xlu1 %v333_v10, %s2481_s11 }
  0xc7   : > { %384 = vperm.xlu1 %2115, %v381_v12  }
 0x108   : > { %v2102_v11 = vpop.permute.xlu2 %2101 }
 0x109   : > { %v2104_v17 = vunpack.i.h.bf16 %v2102_v11  ;;  %v2103_v18 = vunpack.i.l.bf16 %v2102_v11 }
 0x10b   : > { %v365_v27 = vsel %vm364_vm3, %v2103_v18, %v2104_v17 }
 0x110   : > { %v363_v13 = vpop.permute.xlu2 %362 }
 0x111   : > { %v366_v34 = vsel %vm364_vm3, %v2104_v17, %v363_v13 }
 0x118   : > { %v2112_v21 = vpop.permute.xlu2 %2111 }
 0x119   : > { %v2114_v25 = vunpack.i.h.bf16 %v2112_v21  ;;  %v2113_v26 = vunpack.i.l.bf16 %v2112_v21 }
 0x11b   : > { %v343_v30 = vsel %vm342_vm5, %v2113_v26, %v2114_v25 }
 0x120   : > { %v2107_v15 = vpop.permute.xlu0 %2106 }
 0x121   : > { %v2097_v16 = vpop.permute.xlu1 %2096  ;;  %v2109_v22 = vunpack.i.h.bf16 %v2107_v15  ;;  %v2108_v23 = vunpack.i.l.bf16 %v2107_v15  ;;  %v2663_v15 = vpop.f32.mrf.mxu0 }
 0x122   : > { %v2099_v19 = vunpack.i.h.bf16 %v2097_v16  ;;  %v2098_v20 = vunpack.i.l.bf16 %v2097_v16  ;;  %v2665_v16 = vpop.f32.mrf.mxu1 }
 0x123   : > { %v354_v28 = vsel %vm353_vm4, %v2108_v23, %v2109_v22 }
 0x124   : > { %v376_v24 = vsel %vm375_vm2, %v2098_v20, %v2099_v19 }
 0x125   : > { %402 = vmatpush.msra.mxu2 %v376_v24 }
 0x127   : > { %403 = vmatpush.msra.mxu2 %v365_v27 }
 0x128   : > { %v341_v35 = vpop.permute.xlu0 %340 }
 0x129   : > { %v374_v29 = vpop.permute.xlu1 %373  ;;  %404 = vmatpush.msra.mxu2 %v354_v28  ;;  %v344_v38 = vsel %vm342_vm5, %v2114_v25, %v341_v35 }
 0x12a   : > { %v377_v31 = vsel %vm375_vm2, %v2099_v19, %v374_v29 }
 0x12b   : > { %405 = vmatpush.msra.mxu2 %v343_v30  ;;  %422 = vmatpush.msra.mxu3 %v377_v31  ;;  %v271_v30 = vld [vmem:[#allocation6 + $0x18] sm:$0xff]  ;;  %v598_v31 = vld [vmem:[#allocation6 + $0x10] sm:$0xff] }
 0x12d   : > { %1972 = vmatpush.msk.msra.mxu2 %vm2625_vm6, %v324_v5  ;;  %423 = vmatpush.msra.mxu3 %v366_v34 }
 0x12e   : > { %1973 = vmatmul.msk.f32.vlgmr.msra.gmra.mxu2 %vm387_vm7, %v380_v33 }
 0x131   : > { %v352_v36 = vpop.permute.xlu1 %351 }
 0x132   : > { %v355_v37 = vsel %vm353_vm4, %v2109_v22, %v352_v36 }
 0x133   : > { %424 = vmatpush.msra.mxu3 %v355_v37 }
 0x135   : > { %425 = vmatpush.msra.mxu3 %v344_v38 }
 0x137   : > { %426 = vmatpush.msra.mxu3 %v328_v8 }
 0x138   : > { %1974 = vmatmul.msk.f32.vlgmr.msra.gmra.mxu3 %vm387_vm7, %v380_v33 }
 0x139   : > { %v385_v39 = vpop.permute.xlu1 %384 }
 0x1b1   : > { %v408_v40 = vpop.f32.mrf.mxu2 }
 0x1b2   : > { %v409_v41 = vadd.f32 %v408_v40, %v385_v39 }
 0x1b4   : > { %v431_v42 = vmax.f32 %v409_v41, 0.0 }
 0x1b6   : > { %435 = vrot.lane.b32.xlu2 %v431_v42, %s2480_s23 }
 0x1bb   : > { %v428_v43 = vpop.f32.mrf.mxu3 }
 0x1bc   : > { %v429_v44 = vadd.f32 %v428_v43, %v385_v39 }
 0x1be   : > { %v432_v45 = vmax.f32 %v429_v44, 0.0 }
 0x1c0   : > { %437 = vrot.lane.b32.xlu0 %v432_v45, %s2480_s23 }
 0x210   : > { %v436_v46 = vpop.permute.xlu2 %435 }
 0x211   : > { %v443_v48 = vsel %vm327_vm1, 0.0, %v436_v46 }
 0x232   : > { %v438_v47 = vpop.permute.xlu0 %437 }
 0x233   : > { %v439_v49 = vsel %vm327_vm1, %v436_v46, %v438_v47  ;;  %v444_v50 = vsel %vm327_vm1, %v438_v47, 0.0 }
 0x234   : > { %481 = vrot.lane.b32.xlu2 %v444_v50, %s2483_s20  ;;  %v2121_v51 = vpack.i.bf16 %v439_v49, %v443_v48 }
 0x236   : > { %2122 = vrot.lane.b32.xlu0 %v2121_v51, %s2482_s19  ;;  %2117 = vrot.lane.b32.xlu1 %v2121_v51, %s2483_s20 }
 0x23c   : > { %2127 = vrot.lane.b32.xlu2 %v2121_v51, %s2481_s11 }
 0x23e   : > { %461 = vrot.lane.b32.xlu0 %v444_v50, %s2481_s11  ;;  %471 = vrot.lane.b32.xlu1 %v444_v50, %s2482_s19 }
 0x244   : > { %451 = vrot.lane.b32.xlu2 %v444_v50, %s2484_s21 }
 0x246   : > { %2132 = vrot.lane.b32.xlu1 %v2121_v51, %s2484_s21  ;;  %493 = vperm.xlu0 %2136, %v490_v54  }
 0x28e   : > { %v482_v53 = vpop.permute.xlu2 %481 }
 0x296   : > { %v2128_v55 = vpop.permute.xlu2 %2127 }
 0x297   : > { %v2130_v62 = vunpack.i.h.bf16 %v2128_v55  ;;  %v2129_v63 = vunpack.i.l.bf16 %v2128_v55 }
 0x299   : > { %v463_v3 = vsel %vm353_vm4, %v2129_v63, %v2130_v62 }
 0x29e   : > { %v452_v11 = vpop.permute.xlu2 %451 }
 0x2a8   : > { %v2123_v56 = vpop.permute.xlu0 %2122  ;;  %v2118_v57 = vpop.permute.xlu1 %2117 }
 0x2a9   : > { %v2125_v58 = vunpack.i.h.bf16 %v2123_v56  ;;  %v2124_v59 = vunpack.i.l.bf16 %v2123_v56  ;;  %v2120_v60 = vunpack.i.h.bf16 %v2118_v57  ;;  %v2119_v61 = vunpack.i.l.bf16 %v2118_v57  ;;  %v596_v57 = vld [vmem:[#allocation4 + $0x10] sm:$0xff] }
 0x2ab   : > { %v483_v0 = vsel %vm375_vm2, %v2119_v61, %v2120_v60  ;;  %v484_v1 = vsel %vm375_vm2, %v2120_v60, %v482_v53  ;;  %v473_v2 = vsel %vm364_vm3, %v2124_v59, %v2125_v58 }
 0x2ac   : > { %510 = vmatpush.msrb.mxu0 %v483_v0  ;;  %530 = vmatpush.msrb.mxu1 %v484_v1 }
 0x2ae   : > { %511 = vmatpush.msrb.mxu0 %v473_v2 }
 0x2b0   : > { %v462_v4 = vpop.permute.xlu0 %461  ;;  %v472_v5 = vpop.permute.xlu1 %471  ;;  %512 = vmatpush.msrb.mxu0 %v463_v3 }
 0x2b1   : > { %v474_v6 = vsel %vm364_vm3, %v2125_v58, %v472_v5  ;;  %v464_v7 = vsel %vm353_vm4, %v2130_v62, %v462_v4 }
 0x2b2   : > { %531 = vmatpush.msrb.mxu1 %v474_v6 }
 0x2b4   : > { %532 = vmatpush.msrb.mxu1 %v464_v7 }
 0x2b8   : > { %v2133_v8 = vpop.permute.xlu1 %2132  ;;  %v494_v17 = vpop.permute.xlu0 %493 }
 0x2b9   : > { %v2135_v9 = vunpack.i.h.bf16 %v2133_v8  ;;  %v2134_v10 = vunpack.i.l.bf16 %v2133_v8 }
 0x2bb   : > { %v453_v12 = vsel %vm342_vm5, %v2134_v10, %v2135_v9  ;;  %v454_v13 = vsel %vm342_vm5, %v2135_v9, %v452_v11 }
 0x2bc   : > { %513 = vmatpush.msrb.mxu0 %v453_v12  ;;  %533 = vmatpush.msrb.mxu1 %v454_v13  ;;  %v708_v12 = vld [vmem:[#allocation6 + $0x20] sm:$0xff] }
 0x2be   : > { %1976 = vmatpush.msk.msrb.mxu0 %vm2625_vm6, %v436_v46  ;;  %534 = vmatpush.msrb.mxu1 %v439_v49 }
 0x2bf   : > { %1977 = vmatmul.msk.f32.vlgmr.msrb.gmra.mxu0 %vm387_vm7, %v488_v14  ;;  %1978 = vmatmul.msk.f32.vlgmr.msrb.gmra.mxu1 %vm387_vm7, %v488_v14 }
 0x33c   : > { %v516_v18 = vpop.f32.mrf.mxu0  ;;  %v536_v19 = vpop.f32.mrf.mxu1 }
 0x33d   : > { %v517_v20 = vadd.f32 %v516_v18, %v494_v17  ;;  %v537_v21 = vadd.f32 %v536_v19, %v494_v17 }
 0x33f   : > { %v539_v22 = vmax.f32 %v517_v20, 0.0  ;;  %v540_v23 = vmax.f32 %v537_v21, 0.0 }
 0x341   : > { %545 = vrot.lane.b32.xlu2 %v540_v23, %s2480_s23  ;;  %543 = vrot.lane.b32.xlu1 %v539_v22, %s2480_s23 }
 0x39b   : > { %v546_v24 = vpop.permute.xlu2 %545 }
 0x39c   : > { %v552_v25 = vsel %vm327_vm1, %v546_v24, 0.0 }
 0x39d   : > { %589 = vrot.lane.b32.xlu2 %v552_v25, %s2483_s20 }
 0x3b3   : > { %v544_v26 = vpop.permute.xlu1 %543 }
 0x3b4   : > { %v547_v27 = vsel %vm327_vm1, %v544_v26, %v546_v24  ;;  %v551_v28 = vsel %vm327_vm1, 0.0, %v544_v26 }
 0x3b5   : > { %v2147_v29 = vpack.i.bf16 %v547_v27, %v551_v28 }
 0x3b7   : > { %2148 = vrot.lane.b32.xlu2 %v2147_v29, %s2481_s11  ;;  %2143 = vrot.lane.b32.xlu0 %v2147_v29, %s2482_s19 }
 0x3b8   : > { %2138 = vrot.lane.b32.xlu1 %v2147_v29, %s2483_s20 }
 0x3bf   : > { %559 = vrot.lane.b32.xlu2 %v552_v25, %s2484_s21  ;;  %569 = vrot.lane.b32.xlu0 %v552_v25, %s2481_s11 }
 0x3c0   : > { %579 = vrot.lane.b32.xlu1 %v552_v25, %s2482_s19 }
 0x3c7   : > { %274 = vperm.xlu0 %2136, %v271_v30  }
 0x3c8   : > { %2153 = vrot.lane.b32.xlu1 %v2147_v29, %s2484_s21 }
 0x3d0   : > { %601 = vperm.xlu1 %2115, %v598_v31  }
 0x3f7   : > { %v590_v33 = vpop.permute.xlu2 %589 }
 0x411   : > { %v2149_v35 = vpop.permute.xlu2 %2148 }
 0x412   : > { %v2151_v41 = vunpack.i.h.bf16 %v2149_v35  ;;  %v2150_v42 = vunpack.i.l.bf16 %v2149_v35 }
 0x414   : > { %v571_v46 = vsel %vm353_vm4, %v2150_v42, %v2151_v41 }
 0x419   : > { %v560_v54 = vpop.permute.xlu2 %559 }
 0x429   : > { %v2144_v34 = vpop.permute.xlu0 %2143 }
 0x42a   : > { %v2139_v36 = vpop.permute.xlu1 %2138  ;;  %v2146_v37 = vunpack.i.h.bf16 %v2144_v34  ;;  %v2145_v38 = vunpack.i.l.bf16 %v2144_v34 }
 0x42b   : > { %v2141_v39 = vunpack.i.h.bf16 %v2139_v36  ;;  %v2140_v40 = vunpack.i.l.bf16 %v2139_v36 }
 0x42c   : > { %v581_v45 = vsel %vm364_vm3, %v2145_v38, %v2146_v37  ;;  %v706_v38 = vld [vmem:[#allocation4 + $0x20] sm:$0xff] }
 0x42d   : > { %v591_v43 = vsel %vm375_vm2, %v2140_v40, %v2141_v39  ;;  %v592_v44 = vsel %vm375_vm2, %v2141_v39, %v590_v33 }
 0x42e   : > { %618 = vmatpush.msrb.mxu2 %v591_v43  ;;  %638 = vmatpush.msrb.mxu3 %v592_v44 }
 0x430   : > { %619 = vmatpush.msrb.mxu2 %v581_v45 }
 0x431   : > { %v570_v47 = vpop.permute.xlu0 %569 }
 0x432   : > { %v580_v48 = vpop.permute.xlu1 %579  ;;  %620 = vmatpush.msrb.mxu2 %v571_v46  ;;  %v572_v50 = vsel %vm353_vm4, %v2151_v41, %v570_v47 }
 0x433   : > { %v582_v49 = vsel %vm364_vm3, %v2146_v37, %v580_v48 }
 0x434   : > { %639 = vmatpush.msrb.mxu3 %v582_v49 }
 0x436   : > { %640 = vmatpush.msrb.mxu3 %v572_v50 }
 0x439   : > { %v275_v58 = vpop.permute.xlu0 %274 }
 0x43a   : > { %v2154_v51 = vpop.permute.xlu1 %2153  ;;  %v299_v62 = vadd.f32 %v2663_v15, %v275_v58  ;;  %v319_v63 = vadd.f32 %v2665_v16, %v275_v58 }
 0x43b   : > { %v2156_v52 = vunpack.i.h.bf16 %v2154_v51  ;;  %v2155_v53 = vunpack.i.l.bf16 %v2154_v51 }
 0x43d   : > { %v561_v55 = vsel %vm342_vm5, %v2155_v53, %v2156_v52  ;;  %v562_v56 = vsel %vm342_vm5, %v2156_v52, %v560_v54  ;;  %v816_v52 = vld [vmem:[#allocation6 + $0x28] sm:$0xff] }
 0x43e   : > { %621 = vmatpush.msrb.mxu2 %v561_v55  ;;  %641 = vmatpush.msrb.mxu3 %v562_v56 }
 0x440   : > { %1980 = vmatpush.msk.msrb.mxu2 %vm2625_vm6, %v544_v26  ;;  %642 = vmatpush.msrb.mxu3 %v547_v27 }
 0x441   : > { %1981 = vmatmul.msk.f32.vlgmr.msrb.gmra.mxu2 %vm387_vm7, %v596_v57  ;;  %1982 = vmatmul.msk.f32.vlgmr.msrb.gmra.mxu3 %vm387_vm7, %v596_v57 }
 0x442   : > { %v602_v59 = vpop.permute.xlu1 %601 }
 0x4c4   : > { %v624_v60 = vpop.f32.mrf.mxu2  ;;  %v644_v61 = vpop.f32.mrf.mxu3 }
 0x4c5   : > { %v625_v0 = vadd.f32 %v624_v60, %v602_v59  ;;  %v645_v1 = vadd.f32 %v644_v61, %v602_v59 }
 0x4c7   : > { %v2694_v2 = vadd.f32 %v625_v0, %v299_v62  ;;  %v2696_v3 = vadd.f32 %v645_v1, %v319_v63 }
 0x4c9   : > { %v649_v4 = vmax.f32 %v2694_v2, 0.0  ;;  %v650_v5 = vmax.f32 %v2696_v3, 0.0  ;;  %v1036_v3 = vlaneseq }
 0x4cb   : > { %655 = vrot.lane.b32.xlu0 %v650_v5, %s2480_s23  ;;  %653 = vrot.lane.b32.xlu2 %v649_v4, %s2480_s23  ;;  %vm2796_vm9 = vcmp.lt.s32.totalorder %v1036_v3, 256 }
 0x525   : > { %v654_v6 = vpop.permute.xlu2 %653 }
 0x526   : > { %v661_v8 = vsel %vm327_vm1, 0.0, %v654_v6 }
 0x53d   : > { %v656_v7 = vpop.permute.xlu0 %655 }
 0x53e   : > { %v657_v9 = vsel %vm327_vm1, %v654_v6, %v656_v7  ;;  %v662_v10 = vsel %vm327_vm1, %v656_v7, 0.0 }
 0x53f   : > { %699 = vrot.lane.b32.xlu2 %v662_v10, %s2483_s20  ;;  %v2162_v11 = vpack.i.bf16 %v657_v9, %v661_v8 }
 0x541   : > { %2163 = vrot.lane.b32.xlu0 %v2162_v11, %s2482_s19  ;;  %2158 = vrot.lane.b32.xlu1 %v2162_v11, %s2483_s20 }
 0x547   : > { %2168 = vrot.lane.b32.xlu2 %v2162_v11, %s2481_s11 }
 0x549   : > { %679 = vrot.lane.b32.xlu0 %v662_v10, %s2481_s11  ;;  %689 = vrot.lane.b32.xlu1 %v662_v10, %s2482_s19 }
 0x54f   : > { %669 = vrot.lane.b32.xlu2 %v662_v10, %s2484_s21 }
 0x551   : > { %711 = vperm.xlu0 %2136, %v708_v12   ;;  %2173 = vrot.lane.b32.xlu1 %v2162_v11, %s2484_s21 }
 0x599   : > { %v700_v13 = vpop.permute.xlu2 %699 }
 0x5a1   : > { %v2169_v14 = vpop.permute.xlu2 %2168 }
 0x5a2   : > { %v2171_v21 = vunpack.i.h.bf16 %v2169_v14  ;;  %v2170_v22 = vunpack.i.l.bf16 %v2169_v14 }
 0x5a4   : > { %v681_v26 = vsel %vm353_vm4, %v2170_v22, %v2171_v21 }
 0x5a9   : > { %v670_v35 = vpop.permute.xlu2 %669 }
 0x5b3   : > { %v2164_v15 = vpop.permute.xlu0 %2163  ;;  %v2159_v16 = vpop.permute.xlu1 %2158 }
 0x5b4   : > { %v2166_v17 = vunpack.i.h.bf16 %v2164_v15  ;;  %v2165_v18 = vunpack.i.l.bf16 %v2164_v15  ;;  %v2161_v19 = vunpack.i.h.bf16 %v2159_v16  ;;  %v2160_v20 = vunpack.i.l.bf16 %v2159_v16 }
 0x5b6   : > { %v701_v23 = vsel %vm375_vm2, %v2160_v20, %v2161_v19  ;;  %v702_v24 = vsel %vm375_vm2, %v2161_v19, %v700_v13  ;;  %v691_v25 = vsel %vm364_vm3, %v2165_v18, %v2166_v17 }
 0x5b7   : > { %728 = vmatpush.msra.mxu0 %v701_v23  ;;  %748 = vmatpush.msra.mxu1 %v702_v24 }
 0x5b9   : > { %729 = vmatpush.msra.mxu0 %v691_v25 }
 0x5bb   : > { %v680_v27 = vpop.permute.xlu0 %679  ;;  %v690_v28 = vpop.permute.xlu1 %689  ;;  %730 = vmatpush.msra.mxu0 %v681_v26 }
 0x5bc   : > { %v692_v29 = vsel %vm364_vm3, %v2166_v17, %v690_v28  ;;  %v682_v30 = vsel %vm353_vm4, %v2171_v21, %v680_v27  ;;  %v814_v17 = vld [vmem:[#allocation4 + $0x28] sm:$0xff] }
 0x5bd   : > { %749 = vmatpush.msra.mxu1 %v692_v29 }
 0x5bf   : > { %750 = vmatpush.msra.mxu1 %v682_v30 }
 0x5c3   : > { %v2174_v31 = vpop.permute.xlu1 %2173  ;;  %v712_v39 = vpop.permute.xlu0 %711 }
 0x5c4   : > { %v2176_v33 = vunpack.i.h.bf16 %v2174_v31  ;;  %v2175_v34 = vunpack.i.l.bf16 %v2174_v31  ;;  %v924_v31 = vld [vmem:[#allocation6 + $0x30] sm:$0xff] }
 0x5c6   : > { %v671_v36 = vsel %vm342_vm5, %v2175_v34, %v2176_v33  ;;  %v672_v37 = vsel %vm342_vm5, %v2176_v33, %v670_v35  ;;  %v980_v33 = vld [vmem:[#allocation6 + $0x38] sm:$0xff] }
 0x5c7   : > { %731 = vmatpush.msra.mxu0 %v671_v36  ;;  %751 = vmatpush.msra.mxu1 %v672_v37 }
 0x5c9   : > { %1984 = vmatpush.msk.msra.mxu0 %vm2625_vm6, %v654_v6  ;;  %752 = vmatpush.msra.mxu1 %v657_v9 }
 0x5ca   : > { %1985 = vmatmul.msk.f32.vlgmr.msra.gmra.mxu0 %vm387_vm7, %v706_v38  ;;  %1986 = vmatmul.msk.f32.vlgmr.msra.gmra.mxu1 %vm387_vm7, %v706_v38 }
 0x647   : > { %v734_v40 = vpop.f32.mrf.mxu0  ;;  %v754_v41 = vpop.f32.mrf.mxu1 }
 0x648   : > { %v735_v42 = vadd.f32 %v734_v40, %v712_v39  ;;  %v755_v43 = vadd.f32 %v754_v41, %v712_v39 }
 0x64a   : > { %v757_v44 = vmax.f32 %v735_v42, 0.0  ;;  %v758_v45 = vmax.f32 %v755_v43, 0.0 }
 0x64c   : > { %763 = vrot.lane.b32.xlu2 %v758_v45, %s2480_s23  ;;  %761 = vrot.lane.b32.xlu1 %v757_v44, %s2480_s23 }
 0x6a6   : > { %v764_v46 = vpop.permute.xlu2 %763 }
 0x6a7   : > { %v770_v47 = vsel %vm327_vm1, %v764_v46, 0.0 }
 0x6a8   : > { %807 = vrot.lane.b32.xlu1 %v770_v47, %s2483_s20 }
 0x6be   : > { %v762_v48 = vpop.permute.xlu1 %761 }
 0x6bf   : > { %v765_v49 = vsel %vm327_vm1, %v762_v48, %v764_v46  ;;  %v769_v50 = vsel %vm327_vm1, 0.0, %v762_v48 }
 0x6c0   : > { %v2187_v51 = vpack.i.bf16 %v765_v49, %v769_v50 }
 0x6c2   : > { %2188 = vrot.lane.b32.xlu1 %v2187_v51, %s2481_s11  ;;  %2183 = vrot.lane.b32.xlu2 %v2187_v51, %s2482_s19 }
 0x6c3   : > { %2178 = vrot.lane.b32.xlu0 %v2187_v51, %s2483_s20 }
 0x6ca   : > { %777 = vrot.lane.b32.xlu1 %v770_v47, %s2484_s21  ;;  %787 = vrot.lane.b32.xlu2 %v770_v47, %s2481_s11 }
 0x6cb   : > { %797 = vrot.lane.b32.xlu0 %v770_v47, %s2482_s19 }
 0x6d2   : > { %819 = vperm.xlu2 %2197, %v816_v52  }
 0x6d3   : > { %2193 = vrot.lane.b32.xlu0 %v2187_v51, %s2484_s21 }
 0x71a   : > { %v808_v53 = vpop.permute.xlu1 %807 }
 0x71c   : > { %v2184_v54 = vpop.permute.xlu2 %2183 }
 0x71d   : > { %v2186_v57 = vunpack.i.h.bf16 %v2184_v54  ;;  %v2185_v58 = vunpack.i.l.bf16 %v2184_v54 }
 0x71f   : > { %v799_v1 = vsel %vm364_vm3, %v2185_v58, %v2186_v57 }
 0x724   : > { %v788_v9 = vpop.permute.xlu2 %787 }
 0x72c   : > { %v820_v18 = vpop.permute.xlu2 %819 }
 0x734   : > { %v2189_v56 = vpop.permute.xlu1 %2188 }
 0x735   : > { %v2179_v55 = vpop.permute.xlu0 %2178  ;;  %v2191_v61 = vunpack.i.h.bf16 %v2189_v56  ;;  %v2190_v62 = vunpack.i.l.bf16 %v2189_v56  ;;  %v922_v56 = vld [vmem:[#allocation4 + $0x30] sm:$0xff] }
 0x736   : > { %v2181_v59 = vunpack.i.h.bf16 %v2179_v55  ;;  %v2180_v60 = vunpack.i.l.bf16 %v2179_v55 }
 0x737   : > { %v789_v6 = vsel %vm353_vm4, %v2190_v62, %v2191_v61  ;;  %v790_v10 = vsel %vm353_vm4, %v2191_v61, %v788_v9 }
 0x738   : > { %v809_v63 = vsel %vm375_vm2, %v2180_v60, %v2181_v59  ;;  %v810_v0 = vsel %vm375_vm2, %v2181_v59, %v808_v53 }
 0x739   : > { %836 = vmatpush.msra.mxu2 %v809_v63  ;;  %856 = vmatpush.msra.mxu3 %v810_v0 }
 0x73b   : > { %837 = vmatpush.msra.mxu2 %v799_v1 }
 0x73c   : > { %v778_v14 = vpop.permute.xlu1 %777 }
 0x73d   : > { %v798_v7 = vpop.permute.xlu0 %797  ;;  %838 = vmatpush.msra.mxu2 %v789_v6  ;;  %v978_v6 = vld [vmem:[#allocation4 + $0x38] sm:$0xff] }
 0x73e   : > { %v800_v8 = vsel %vm364_vm3, %v2186_v57, %v798_v7 }
 0x73f   : > { %857 = vmatpush.msra.mxu3 %v800_v8 }
 0x741   : > { %858 = vmatpush.msra.mxu3 %v790_v10 }
 0x745   : > { %v2194_v11 = vpop.permute.xlu0 %2193 }
 0x746   : > { %v2196_v12 = vunpack.i.h.bf16 %v2194_v11  ;;  %v2195_v13 = vunpack.i.l.bf16 %v2194_v11 }
 0x748   : > { %v779_v15 = vsel %vm342_vm5, %v2195_v13, %v2196_v12  ;;  %v780_v16 = vsel %vm342_vm5, %v2196_v12, %v778_v14 }
 0x749   : > { %839 = vmatpush.msra.mxu2 %v779_v15  ;;  %859 = vmatpush.msra.mxu3 %v780_v16 }
 0x74b   : > { %1988 = vmatpush.msk.msra.mxu2 %vm2625_vm6, %v762_v48  ;;  %860 = vmatpush.msra.mxu3 %v765_v49 }
 0x74c   : > { %1989 = vmatmul.msk.f32.vlgmr.msra.gmra.mxu2 %vm387_vm7, %v814_v17  ;;  %1990 = vmatmul.msk.f32.vlgmr.msra.gmra.mxu3 %vm387_vm7, %v814_v17 }
 0x7cf   : > { %v842_v19 = vpop.f32.mrf.mxu2  ;;  %v862_v20 = vpop.f32.mrf.mxu3 }
 0x7d0   : > { %v843_v21 = vadd.f32 %v842_v19, %v820_v18  ;;  %v863_v22 = vadd.f32 %v862_v20, %v820_v18 }
 0x7d2   : > { %v865_v23 = vmax.f32 %v843_v21, 0.0  ;;  %v866_v24 = vmax.f32 %v863_v22, 0.0  ;;  %v1148_v22 = vld [vmem:[#allocation6 + $0x40] sm:$0xff] }
 0x7d4   : > { %871 = vrot.lane.b32.xlu1 %v866_v24, %s2480_s23  ;;  %869 = vrot.lane.b32.xlu0 %v865_v23, %s2480_s23 }
 0x846   : > { %v872_v25 = vpop.permute.xlu1 %871  ;;  %v870_v26 = vpop.permute.xlu0 %869 }
 0x847   : > { %v878_v27 = vsel %vm327_vm1, %v872_v25, 0.0  ;;  %v873_v28 = vsel %vm327_vm1, %v870_v26, %v872_v25  ;;  %v877_v29 = vsel %vm327_vm1, 0.0, %v870_v26 }
 0x848   : > { %915 = vrot.lane.b32.xlu0 %v878_v27, %s2483_s20  ;;  %v2203_v30 = vpack.i.bf16 %v873_v28, %v877_v29 }
 0x84a   : > { %2204 = vrot.lane.b32.xlu1 %v2203_v30, %s2482_s19  ;;  %2199 = vrot.lane.b32.xlu2 %v2203_v30, %s2483_s20 }
 0x850   : > { %2209 = vrot.lane.b32.xlu0 %v2203_v30, %s2481_s11 }
 0x852   : > { %895 = vrot.lane.b32.xlu1 %v878_v27, %s2481_s11  ;;  %905 = vrot.lane.b32.xlu2 %v878_v27, %s2482_s19 }
 0x858   : > { %885 = vrot.lane.b32.xlu0 %v878_v27, %s2484_s21 }
 0x85a   : > { %927 = vperm.xlu1 %2115, %v924_v31   ;;  %2214 = vrot.lane.b32.xlu2 %v2203_v30, %s2484_s21 }
 0x862   : > { %983 = vperm.xlu2 %2197, %v980_v33  }
 0x8a4   : > { %v2200_v34 = vpop.permute.xlu2 %2199 }
 0x8a5   : > { %v2202_v35 = vunpack.i.h.bf16 %v2200_v34  ;;  %v2201_v36 = vunpack.i.l.bf16 %v2200_v34 }
 0x8a7   : > { %v917_v37 = vsel %vm375_vm2, %v2201_v36, %v2202_v35 }
 0x8a8   : > { %944 = vmatpush.msrb.mxu0 %v917_v37 }
 0x8ac   : > { %v906_v38 = vpop.permute.xlu2 %905 }
 0x8b4   : > { %v2215_v46 = vpop.permute.xlu2 %2214 }
 0x8b5   : > { %v2217_v48 = vunpack.i.h.bf16 %v2215_v46  ;;  %v2216_v49 = vunpack.i.l.bf16 %v2215_v46  ;;  %v1146_v46 = vld [vmem:[#allocation4 + $0x40] sm:$0xff] }
 0x8b7   : > { %v887_v55 = vsel %vm342_vm5, %v2216_v49, %v2217_v48 }
 0x8ba   : > { %v916_v39 = vpop.permute.xlu0 %915 }
 0x8bb   : > { %v918_v40 = vsel %vm375_vm2, %v2202_v35, %v916_v39 }
 0x8bc   : > { %v2205_v41 = vpop.permute.xlu1 %2204  ;;  %964 = vmatpush.msrb.mxu1 %v918_v40  ;;  %v984_v9 = vpop.permute.xlu2 %983 }
 0x8bd   : > { %v2207_v42 = vunpack.i.h.bf16 %v2205_v41  ;;  %v2206_v43 = vunpack.i.l.bf16 %v2205_v41 }
 0x8bf   : > { %v907_v44 = vsel %vm364_vm3, %v2206_v43, %v2207_v42  ;;  %v908_v45 = vsel %vm364_vm3, %v2207_v42, %v906_v38 }
 0x8c0   : > { %945 = vmatpush.msrb.mxu0 %v907_v44  ;;  %965 = vmatpush.msrb.mxu1 %v908_v45 }
 0x8c2   : > { %v2210_v47 = vpop.permute.xlu0 %2209 }
 0x8c3   : > { %v2212_v50 = vunpack.i.h.bf16 %v2210_v47  ;;  %v2211_v51 = vunpack.i.l.bf16 %v2210_v47 }
 0x8c4   : > { %v896_v52 = vpop.permute.xlu1 %895 }
 0x8c5   : > { %v897_v53 = vsel %vm353_vm4, %v2211_v51, %v2212_v50  ;;  %v898_v54 = vsel %vm353_vm4, %v2212_v50, %v896_v52 }
 0x8c6   : > { %946 = vmatpush.msrb.mxu0 %v897_v53  ;;  %966 = vmatpush.msrb.mxu1 %v898_v54 }
 0x8c8   : > { %947 = vmatpush.msrb.mxu0 %v887_v55 }
 0x8ca   : > { %v886_v57 = vpop.permute.xlu0 %885  ;;  %1992 = vmatpush.msk.msrb.mxu0 %vm2625_vm6, %v870_v26 }
 0x8cb   : > { %1993 = vmatmul.msk.f32.vlgmr.msrb.gmra.mxu0 %vm387_vm7, %v922_v56  ;;  %v888_v58 = vsel %vm342_vm5, %v2217_v48, %v886_v57 }
 0x8cc   : > { %967 = vmatpush.msrb.mxu1 %v888_v58  ;;  %v928_v59 = vpop.permute.xlu1 %927 }
 0x8ce   : > { %968 = vmatpush.msrb.mxu1 %v873_v28 }
 0x8cf   : > { %1994 = vmatmul.msk.f32.vlgmr.msrb.gmra.mxu1 %vm387_vm7, %v922_v56 }
 0x948   : > { %v950_v60 = vpop.f32.mrf.mxu0 }
 0x949   : > { %v951_v61 = vadd.f32 %v950_v60, %v928_v59 }
 0x94b   : > { %v973_v62 = vadd.f32 %v951_v61, %v649_v4 }
 0x94c   : > { %v970_v63 = vpop.f32.mrf.mxu1 }
 0x94d   : > { %v975_v0 = vmax.f32 %v973_v62, 0.0  ;;  %v971_v1 = vadd.f32 %v970_v63, %v928_v59  ;;  %v1256_v62 = vld [vmem:[#allocation6 + $0x48] sm:$0xff]  ;;  %v1042_v63 = vld [vmem:[#allocation4 + $0x58] sm:$0xff] }
 0x94f   : > { %v974_v7 = vadd.f32 %v971_v1, %v650_v5  ;;  %1004 = vmatpush.msrb.mxu2 %v975_v0 }
 0x950   : > { %1995 = vmatmul.msk.f32.vlgmr.msrb.gmra.mxu2 %vm277_vm8, %v978_v6 }
 0x951   : > { %v976_v8 = vmax.f32 %v974_v7, 0.0 }
 0x953   : > { %1024 = vmatpush.msrb.mxu3 %v976_v8 }
 0x954   : > { %1996 = vmatmul.msk.f32.vlgmr.msrb.gmra.mxu3 %vm277_vm8, %v978_v6 }
 0x9d3   : > { %v1006_v10 = vpop.f32.mrf.mxu2 }
 0x9d4   : > { %v1007_v2 = vadd.f32 %v1006_v10, %v984_v9 }
 0x9d6   : > { %v1029_v4 = vmax.f32 %v1007_v2, 0.0 }
 0x9d7   : > { %v1026_v11 = vpop.f32.mrf.mxu3 }
 0x9d8   : > { %v1027_v12 = vadd.f32 %v1026_v11, %v984_v9  ;;  %1093 = vrot.lane.b32.xlu0 %v1029_v4, %s2480_s23  ;;  %1068 = vmatpush.msra.mxu0 %v1029_v4 }
 0x9d9   : > { %1997 = vmatmul.msk.f32.vlgmr.msra.gmra.mxu0 %vm277_vm8, %v1042_v63 }
 0x9da   : > { %v1030_v5 = vmax.f32 %v1027_v12, 0.0 }
 0x9dc   : > { %v1033_v13 = vrot.slane %v1030_v5, 7  ;;  %1095 = vrot.lane.b32.xlu1 %v1030_v5, %s2480_s23  ;;  %1088 = vmatpush.msra.mxu1 %v1030_v5 }
 0x9dd   : > { %1998 = vmatmul.msk.f32.vlgmr.msra.gmra.mxu1 %vm277_vm8, %v1042_v63 }
 0x9de   : > { %v1034_v15 = vsel %vm265_vm0, %v1029_v4, %v1033_v13 }
 0x9df   : > { %1040 = vst.msk [vmem:[%s254_s15] sm:$0x3] %vm2796_vm9, %v1034_v15 }
 0xa4a   : > { %v1094_v16 = vpop.permute.xlu0 %1093 }
 0xa4b   : > { %v1101_v18 = vsel %vm327_vm1, 0.0, %v1094_v16 }
 0xa4e   : > { %v1096_v17 = vpop.permute.xlu1 %1095 }
 0xa4f   : > { %v1097_v19 = vsel %vm327_vm1, %v1094_v16, %v1096_v17  ;;  %v1102_v20 = vsel %vm327_vm1, %v1096_v17, 0.0 }
 0xa50   : > { %1139 = vrot.lane.b32.xlu0 %v1102_v20, %s2483_s20  ;;  %v2223_v21 = vpack.i.bf16 %v1097_v19, %v1101_v18 }
 0xa52   : > { %2224 = vrot.lane.b32.xlu1 %v2223_v21, %s2482_s19  ;;  %2219 = vrot.lane.b32.xlu2 %v2223_v21, %s2483_s20 }
 0xa58   : > { %2229 = vrot.lane.b32.xlu0 %v2223_v21, %s2481_s11 }
 0xa5a   : > { %1119 = vrot.lane.b32.xlu1 %v1102_v20, %s2481_s11  ;;  %1129 = vrot.lane.b32.xlu2 %v1102_v20, %s2482_s19 }
 0xa60   : > { %1109 = vrot.lane.b32.xlu0 %v1102_v20, %s2484_s21 }
 0xa62   : > { %1151 = vperm.xlu1 %2115, %v1148_v22   ;;  %2234 = vrot.lane.b32.xlu2 %v2223_v21, %s2484_s21 }
 0xaac   : > { %v2220_v23 = vpop.permute.xlu2 %2219 }
 0xaad   : > { %v2222_v24 = vunpack.i.h.bf16 %v2220_v23  ;;  %v2221_v25 = vunpack.i.l.bf16 %v2220_v23 }
 0xaaf   : > { %v1141_v26 = vsel %vm375_vm2, %v2221_v25, %v2222_v24  ;;  %v1254_v25 = vld [vmem:[#allocation4 + $0x48] sm:$0xff] }
 0xab0   : > { %1168 = vmatpush.msra.mxu2 %v1141_v26  ;;  %v2854_v26 = vpop.f32.mrf.mxu0 }
 0xab4   : > { %v1130_v27 = vpop.permute.xlu2 %1129 }
 0xabc   : > { %v2235_v36 = vpop.permute.xlu2 %2234 }
 0xabd   : > { %v2237_v38 = vunpack.i.h.bf16 %v2235_v36  ;;  %v2236_v39 = vunpack.i.l.bf16 %v2235_v36 }
 0xabf   : > { %v1111_v45 = vsel %vm342_vm5, %v2236_v39, %v2237_v38 }
 0xac2   : > { %v1140_v28 = vpop.permute.xlu0 %1139 }
 0xac3   : > { %v1142_v29 = vsel %vm375_vm2, %v2222_v24, %v1140_v28 }
 0xac4   : > { %v2225_v30 = vpop.permute.xlu1 %2224  ;;  %1188 = vmatpush.msra.mxu3 %v1142_v29 }
 0xac5   : > { %v2227_v31 = vunpack.i.h.bf16 %v2225_v30  ;;  %v2226_v33 = vunpack.i.l.bf16 %v2225_v30 }
 0xac7   : > { %v1131_v34 = vsel %vm364_vm3, %v2226_v33, %v2227_v31  ;;  %v1132_v35 = vsel %vm364_vm3, %v2227_v31, %v1130_v27  ;;  %v2856_v27 = vpop.f32.mrf.mxu1 }
 0xac8   : > { %1169 = vmatpush.msra.mxu2 %v1131_v34  ;;  %1189 = vmatpush.msra.mxu3 %v1132_v35 }
 0xaca   : > { %v2230_v37 = vpop.permute.xlu0 %2229 }
 0xacb   : > { %v2232_v40 = vunpack.i.h.bf16 %v2230_v37  ;;  %v2231_v41 = vunpack.i.l.bf16 %v2230_v37 }
 0xacc   : > { %v1120_v42 = vpop.permute.xlu1 %1119 }
 0xacd   : > { %v1121_v43 = vsel %vm353_vm4, %v2231_v41, %v2232_v40  ;;  %v1122_v44 = vsel %vm353_vm4, %v2232_v40, %v1120_v42  ;;  %v1044_v42 = vld [vmem:[#allocation6 + $0x58] sm:$0xff] }
 0xace   : > { %1170 = vmatpush.msra.mxu2 %v1121_v43  ;;  %1190 = vmatpush.msra.mxu3 %v1122_v44  ;;  %v1364_v43 = vld [vmem:[#allocation6 + $0x50] sm:$0xff] }
 0xad0   : > { %1171 = vmatpush.msra.mxu2 %v1111_v45 }
 0xad2   : > { %v1110_v47 = vpop.permute.xlu0 %1109  ;;  %2000 = vmatpush.msk.msra.mxu2 %vm2625_vm6, %v1094_v16 }
 0xad3   : > { %2001 = vmatmul.msk.f32.vlgmr.msra.gmra.mxu2 %vm387_vm7, %v1146_v46  ;;  %v1112_v48 = vsel %vm342_vm5, %v2237_v38, %v1110_v47 }
 0xad4   : > { %1191 = vmatpush.msra.mxu3 %v1112_v48  ;;  %v1152_v49 = vpop.permute.xlu1 %1151 }
 0xad6   : > { %1192 = vmatpush.msra.mxu3 %v1097_v19 }
 0xad7   : > { %2002 = vmatmul.msk.f32.vlgmr.msra.gmra.mxu3 %vm387_vm7, %v1146_v46 }
 0xb56   : > { %v1174_v50 = vpop.f32.mrf.mxu2 }
 0xb57   : > { %v1175_v51 = vadd.f32 %v1174_v50, %v1152_v49 }
 0xb59   : > { %v1197_v52 = vmax.f32 %v1175_v51, 0.0 }
 0xb5a   : > { %v1194_v53 = vpop.f32.mrf.mxu3 }
 0xb5b   : > { %v1195_v54 = vadd.f32 %v1194_v53, %v1152_v49  ;;  %1201 = vrot.lane.b32.xlu2 %v1197_v52, %s2480_s23 }
 0xb5d   : > { %v1198_v55 = vmax.f32 %v1195_v54, 0.0 }
 0xb5f   : > { %1203 = vrot.lane.b32.xlu0 %v1198_v55, %s2480_s23 }
 0xbb5   : > { %v1202_v56 = vpop.permute.xlu2 %1201 }
 0xbb6   : > { %v1209_v58 = vsel %vm327_vm1, 0.0, %v1202_v56 }
 0xbd1   : > { %v1204_v57 = vpop.permute.xlu0 %1203 }
 0xbd2   : > { %v1205_v59 = vsel %vm327_vm1, %v1202_v56, %v1204_v57  ;;  %v1210_v60 = vsel %vm327_vm1, %v1204_v57, 0.0 }
 0xbd3   : > { %1247 = vrot.lane.b32.xlu2 %v1210_v60, %s2483_s20  ;;  %v2243_v61 = vpack.i.bf16 %v1205_v59, %v1209_v58 }
 0xbd5   : > { %2244 = vrot.lane.b32.xlu0 %v2243_v61, %s2482_s19  ;;  %2239 = vrot.lane.b32.xlu1 %v2243_v61, %s2483_s20 }
 0xbdb   : > { %2249 = vrot.lane.b32.xlu2 %v2243_v61, %s2481_s11 }
 0xbdd   : > { %1227 = vrot.lane.b32.xlu0 %v1210_v60, %s2481_s11  ;;  %1237 = vrot.lane.b32.xlu1 %v1210_v60, %s2482_s19 }
 0xbe3   : > { %1217 = vrot.lane.b32.xlu2 %v1210_v60, %s2484_s21 }
 0xbe5   : > { %1259 = vperm.xlu0 %2136, %v1256_v62   ;;  %2254 = vrot.lane.b32.xlu1 %v2243_v61, %s2484_s21 }
 0xc2d   : > { %v1248_v0 = vpop.permute.xlu2 %1247 }
 0xc35   : > { %v2250_v1 = vpop.permute.xlu2 %2249 }
 0xc36   : > { %v2252_v4 = vunpack.i.h.bf16 %v2250_v1  ;;  %v2251_v11 = vunpack.i.l.bf16 %v2250_v1 }
 0xc38   : > { %v1229_v13 = vsel %vm353_vm4, %v2251_v11, %v2252_v4 }
 0xc3d   : > { %v1218_v22 = vpop.permute.xlu2 %1217 }
 0xc47   : > { %v2245_v6 = vpop.permute.xlu0 %2244  ;;  %v2240_v7 = vpop.permute.xlu1 %2239 }
 0xc48   : > { %v2247_v8 = vunpack.i.h.bf16 %v2245_v6  ;;  %v2246_v9 = vunpack.i.l.bf16 %v2245_v6  ;;  %v2242_v10 = vunpack.i.h.bf16 %v2240_v7  ;;  %v2241_v2 = vunpack.i.l.bf16 %v2240_v7 }
 0xc4a   : > { %v1249_v12 = vsel %vm375_vm2, %v2241_v2, %v2242_v10  ;;  %v1250_v3 = vsel %vm375_vm2, %v2242_v10, %v1248_v0  ;;  %v1239_v5 = vsel %vm364_vm3, %v2246_v9, %v2247_v8 }
 0xc4b   : > { %1276 = vmatpush.msrb.mxu0 %v1249_v12  ;;  %1296 = vmatpush.msrb.mxu1 %v1250_v3 }
 0xc4d   : > { %1277 = vmatpush.msrb.mxu0 %v1239_v5 }
 0xc4f   : > { %v1228_v15 = vpop.permute.xlu0 %1227  ;;  %v1238_v16 = vpop.permute.xlu1 %1237  ;;  %1278 = vmatpush.msrb.mxu0 %v1229_v13 }
 0xc50   : > { %v1240_v17 = vsel %vm364_vm3, %v2247_v8, %v1238_v16  ;;  %v1230_v18 = vsel %vm353_vm4, %v2252_v4, %v1228_v15  ;;  %v1362_v8 = vld [vmem:[#allocation4 + $0x50] sm:$0xff] }
 0xc51   : > { %1297 = vmatpush.msrb.mxu1 %v1240_v17 }
 0xc53   : > { %1298 = vmatpush.msrb.mxu1 %v1230_v18 }
 0xc57   : > { %v2255_v19 = vpop.permute.xlu1 %2254  ;;  %v1260_v28 = vpop.permute.xlu0 %1259 }
 0xc58   : > { %v2257_v20 = vunpack.i.h.bf16 %v2255_v19  ;;  %v2256_v21 = vunpack.i.l.bf16 %v2255_v19 }
 0xc5a   : > { %v1219_v23 = vsel %vm342_vm5, %v2256_v21, %v2257_v20  ;;  %v1220_v24 = vsel %vm342_vm5, %v2257_v20, %v1218_v22 }
 0xc5b   : > { %1279 = vmatpush.msrb.mxu0 %v1219_v23  ;;  %1299 = vmatpush.msrb.mxu1 %v1220_v24  ;;  %v1474_v24 = vld [vmem:[#allocation6 + $0x60] sm:$0xff] }
 0xc5d   : > { %2004 = vmatpush.msk.msrb.mxu0 %vm2625_vm6, %v1202_v56  ;;  %1300 = vmatpush.msrb.mxu1 %v1205_v59 }
 0xc5e   : > { %2005 = vmatmul.msk.f32.vlgmr.msrb.gmra.mxu0 %vm387_vm7, %v1254_v25  ;;  %2006 = vmatmul.msk.f32.vlgmr.msrb.gmra.mxu1 %vm387_vm7, %v1254_v25 }
 0xcdb   : > { %v1282_v29 = vpop.f32.mrf.mxu0  ;;  %v1302_v30 = vpop.f32.mrf.mxu1 }
 0xcdc   : > { %v1283_v31 = vadd.f32 %v1282_v29, %v1260_v28  ;;  %v1303_v33 = vadd.f32 %v1302_v30, %v1260_v28 }
 0xcde   : > { %v1305_v34 = vmax.f32 %v1283_v31, 0.0  ;;  %v1306_v35 = vmax.f32 %v1303_v33, 0.0 }
 0xce0   : > { %1311 = vrot.lane.b32.xlu2 %v1306_v35, %s2480_s23  ;;  %1309 = vrot.lane.b32.xlu1 %v1305_v34, %s2480_s23 }
 0xd3a   : > { %v1312_v36 = vpop.permute.xlu2 %1311 }
 0xd3b   : > { %v1318_v37 = vsel %vm327_vm1, %v1312_v36, 0.0 }
 0xd3c   : > { %1355 = vrot.lane.b32.xlu1 %v1318_v37, %s2483_s20 }
 0xd52   : > { %v1310_v38 = vpop.permute.xlu1 %1309 }
 0xd53   : > { %v1313_v39 = vsel %vm327_vm1, %v1310_v38, %v1312_v36  ;;  %v1317_v40 = vsel %vm327_vm1, 0.0, %v1310_v38 }
 0xd54   : > { %v2268_v41 = vpack.i.bf16 %v1313_v39, %v1317_v40 }
 0xd56   : > { %2269 = vrot.lane.b32.xlu1 %v2268_v41, %s2481_s11  ;;  %2264 = vrot.lane.b32.xlu2 %v2268_v41, %s2482_s19 }
 0xd57   : > { %2259 = vrot.lane.b32.xlu0 %v2268_v41, %s2483_s20 }
 0xd5e   : > { %1325 = vrot.lane.b32.xlu1 %v1318_v37, %s2484_s21  ;;  %1335 = vrot.lane.b32.xlu2 %v1318_v37, %s2481_s11 }
 0xd5f   : > { %1345 = vrot.lane.b32.xlu0 %v1318_v37, %s2482_s19 }
 0xd66   : > { %1047 = vperm.xlu2 %2197, %v1044_v42  }
 0xd67   : > { %2274 = vrot.lane.b32.xlu0 %v2268_v41, %s2484_s21 }
 0xd6f   : > { %1367 = vperm.xlu0 %2136, %v1364_v43  }
 0xdae   : > { %v1356_v44 = vpop.permute.xlu1 %1355 }
 0xdb0   : > { %v2265_v45 = vpop.permute.xlu2 %2264 }
 0xdb1   : > { %v2267_v48 = vunpack.i.h.bf16 %v2265_v45  ;;  %v2266_v49 = vunpack.i.l.bf16 %v2265_v45 }
 0xdb3   : > { %v1347_v56 = vsel %vm364_vm3, %v2266_v49, %v2267_v48 }
 0xdb8   : > { %v1336_v60 = vpop.permute.xlu2 %1335 }
 0xdc0   : > { %v1048_v9 = vpop.permute.xlu2 %1047 }
 0xdc1   : > { %v1071_v11 = vadd.f32 %v2854_v26, %v1048_v9  ;;  %v1091_v12 = vadd.f32 %v2856_v27, %v1048_v9 }
 0xdc8   : > { %v2270_v47 = vpop.permute.xlu1 %2269 }
 0xdc9   : > { %v2260_v46 = vpop.permute.xlu0 %2259  ;;  %v2272_v52 = vunpack.i.h.bf16 %v2270_v47  ;;  %v2271_v53 = vunpack.i.l.bf16 %v2270_v47 }
 0xdca   : > { %v2262_v50 = vunpack.i.h.bf16 %v2260_v46  ;;  %v2261_v51 = vunpack.i.l.bf16 %v2260_v46 }
 0xdcb   : > { %v1337_v57 = vsel %vm353_vm4, %v2271_v53, %v2272_v52  ;;  %v1338_v61 = vsel %vm353_vm4, %v2272_v52, %v1336_v60 }
 0xdcc   : > { %v1357_v54 = vsel %vm375_vm2, %v2261_v51, %v2262_v50  ;;  %v1358_v55 = vsel %vm375_vm2, %v2262_v50, %v1356_v44  ;;  %v1472_v50 = vld [vmem:[#allocation4 + $0x60] sm:$0xff] }
 0xdcd   : > { %1384 = vmatpush.msrb.mxu2 %v1357_v54  ;;  %1404 = vmatpush.msrb.mxu3 %v1358_v55 }
 0xdcf   : > { %1385 = vmatpush.msrb.mxu2 %v1347_v56 }
 0xdd0   : > { %v1326_v1 = vpop.permute.xlu1 %1325 }
 0xdd1   : > { %v1346_v58 = vpop.permute.xlu0 %1345  ;;  %1386 = vmatpush.msrb.mxu2 %v1337_v57 }
 0xdd2   : > { %v1348_v59 = vsel %vm364_vm3, %v2267_v48, %v1346_v58 }
 0xdd3   : > { %1405 = vmatpush.msrb.mxu3 %v1348_v59 }
 0xdd5   : > { %1406 = vmatpush.msrb.mxu3 %v1338_v61 }
 0xdd9   : > { %v2275_v62 = vpop.permute.xlu0 %2274 }
 0xdda   : > { %v2277_v63 = vunpack.i.h.bf16 %v2275_v62  ;;  %v2276_v0 = vunpack.i.l.bf16 %v2275_v62 }
 0xddc   : > { %v1327_v6 = vsel %vm342_vm5, %v2276_v0, %v2277_v63  ;;  %v1328_v7 = vsel %vm342_vm5, %v2277_v63, %v1326_v1  ;;  %v1582_v0 = vld [vmem:[#allocation6 + $0x68] sm:$0xff] }
 0xddd   : > { %1387 = vmatpush.msrb.mxu2 %v1327_v6  ;;  %1407 = vmatpush.msrb.mxu3 %v1328_v7 }
 0xddf   : > { %2008 = vmatpush.msk.msrb.mxu2 %vm2625_vm6, %v1310_v38  ;;  %1408 = vmatpush.msrb.mxu3 %v1313_v39 }
 0xde0   : > { %2009 = vmatmul.msk.f32.vlgmr.msrb.gmra.mxu2 %vm387_vm7, %v1362_v8  ;;  %2010 = vmatmul.msk.f32.vlgmr.msrb.gmra.mxu3 %vm387_vm7, %v1362_v8 }
 0xde1   : > { %v1368_v10 = vpop.permute.xlu0 %1367 }
 0xe63   : > { %v1390_v2 = vpop.f32.mrf.mxu2  ;;  %v1410_v4 = vpop.f32.mrf.mxu3 }
 0xe64   : > { %v1391_v3 = vadd.f32 %v1390_v2, %v1368_v10  ;;  %v1411_v5 = vadd.f32 %v1410_v4, %v1368_v10 }
 0xe66   : > { %v2885_v13 = vadd.f32 %v1391_v3, %v1071_v11  ;;  %v2887_v15 = vadd.f32 %v1411_v5, %v1091_v12 }
 0xe68   : > { %v1415_v16 = vmax.f32 %v2885_v13, 0.0  ;;  %v1416_v17 = vmax.f32 %v2887_v15, 0.0 }
 0xe6a   : > { %1421 = vrot.lane.b32.xlu2 %v1416_v17, %s2480_s23  ;;  %1419 = vrot.lane.b32.xlu1 %v1415_v16, %s2480_s23 }
 0xec4   : > { %v1422_v18 = vpop.permute.xlu2 %1421 }
 0xec5   : > { %v1428_v19 = vsel %vm327_vm1, %v1422_v18, 0.0 }
 0xec6   : > { %1465 = vrot.lane.b32.xlu1 %v1428_v19, %s2483_s20 }
 0xedc   : > { %v1420_v20 = vpop.permute.xlu1 %1419 }
 0xedd   : > { %v1423_v21 = vsel %vm327_vm1, %v1420_v20, %v1422_v18  ;;  %v1427_v22 = vsel %vm327_vm1, 0.0, %v1420_v20 }
 0xede   : > { %v2288_v23 = vpack.i.bf16 %v1423_v21, %v1427_v22 }
 0xee0   : > { %2289 = vrot.lane.b32.xlu1 %v2288_v23, %s2481_s11  ;;  %2284 = vrot.lane.b32.xlu2 %v2288_v23, %s2482_s19 }
 0xee1   : > { %2279 = vrot.lane.b32.xlu0 %v2288_v23, %s2483_s20 }
 0xee8   : > { %1435 = vrot.lane.b32.xlu1 %v1428_v19, %s2484_s21  ;;  %1445 = vrot.lane.b32.xlu2 %v1428_v19, %s2481_s11 }
 0xee9   : > { %1455 = vrot.lane.b32.xlu0 %v1428_v19, %s2482_s19 }
 0xef0   : > { %1477 = vperm.xlu2 %2197, %v1474_v24  }
 0xef1   : > { %2294 = vrot.lane.b32.xlu0 %v2288_v23, %s2484_s21 }
 0xf38   : > { %v1466_v25 = vpop.permute.xlu1 %1465 }
 0xf3a   : > { %v2285_v26 = vpop.permute.xlu2 %2284 }
 0xf3b   : > { %v2287_v29 = vunpack.i.h.bf16 %v2285_v26  ;;  %v2286_v30 = vunpack.i.l.bf16 %v2285_v26 }
 0xf3d   : > { %v1457_v38 = vsel %vm364_vm3, %v2286_v30, %v2287_v29 }
 0xf42   : > { %v1446_v42 = vpop.permute.xlu2 %1445 }
 0xf4a   : > { %v1478_v51 = vpop.permute.xlu2 %1477 }
 0xf52   : > { %v2290_v28 = vpop.permute.xlu1 %2289 }
 0xf53   : > { %v2280_v27 = vpop.permute.xlu0 %2279  ;;  %v2292_v34 = vunpack.i.h.bf16 %v2290_v28  ;;  %v2291_v35 = vunpack.i.l.bf16 %v2290_v28  ;;  %v1580_v28 = vld [vmem:[#allocation4 + $0x68] sm:$0xff] }
 0xf54   : > { %v2282_v31 = vunpack.i.h.bf16 %v2280_v27  ;;  %v2281_v33 = vunpack.i.l.bf16 %v2280_v27 }
 0xf55   : > { %v1447_v39 = vsel %vm353_vm4, %v2291_v35, %v2292_v34  ;;  %v1448_v43 = vsel %vm353_vm4, %v2292_v34, %v1446_v42 }
 0xf56   : > { %v1467_v36 = vsel %vm375_vm2, %v2281_v33, %v2282_v31  ;;  %v1468_v37 = vsel %vm375_vm2, %v2282_v31, %v1466_v25 }
 0xf57   : > { %1494 = vmatpush.msra.mxu0 %v1467_v36  ;;  %1514 = vmatpush.msra.mxu1 %v1468_v37 }
 0xf59   : > { %1495 = vmatpush.msra.mxu0 %v1457_v38 }
 0xf5a   : > { %v1436_v47 = vpop.permute.xlu1 %1435 }
 0xf5b   : > { %v1456_v40 = vpop.permute.xlu0 %1455  ;;  %1496 = vmatpush.msra.mxu0 %v1447_v39 }
 0xf5c   : > { %v1458_v41 = vsel %vm364_vm3, %v2287_v29, %v1456_v40 }
 0xf5d   : > { %1515 = vmatpush.msra.mxu1 %v1458_v41 }
 0xf5f   : > { %1516 = vmatpush.msra.mxu1 %v1448_v43 }
 0xf63   : > { %v2295_v44 = vpop.permute.xlu0 %2294 }
 0xf64   : > { %v2297_v45 = vunpack.i.h.bf16 %v2295_v44  ;;  %v2296_v46 = vunpack.i.l.bf16 %v2295_v44 }
 0xf66   : > { %v1437_v48 = vsel %vm342_vm5, %v2296_v46, %v2297_v45  ;;  %v1438_v49 = vsel %vm342_vm5, %v2297_v45, %v1436_v47  ;;  %v1690_v45 = vld [vmem:[#allocation6 + $0x70] sm:$0xff]  ;;  %v1746_v46 = vld [vmem:[#allocation6 + $0x78] sm:$0xff] }
 0xf67   : > { %1497 = vmatpush.msra.mxu0 %v1437_v48  ;;  %1517 = vmatpush.msra.mxu1 %v1438_v49 }
 0xf69   : > { %2012 = vmatpush.msk.msra.mxu0 %vm2625_vm6, %v1420_v20  ;;  %1518 = vmatpush.msra.mxu1 %v1423_v21 }
 0xf6a   : > { %2013 = vmatmul.msk.f32.vlgmr.msra.gmra.mxu0 %vm387_vm7, %v1472_v50  ;;  %2014 = vmatmul.msk.f32.vlgmr.msra.gmra.mxu1 %vm387_vm7, %v1472_v50 }
 0xfe7   : > { %v1500_v52 = vpop.f32.mrf.mxu0  ;;  %v1520_v53 = vpop.f32.mrf.mxu1 }
 0xfe8   : > { %v1501_v54 = vadd.f32 %v1500_v52, %v1478_v51  ;;  %v1521_v55 = vadd.f32 %v1520_v53, %v1478_v51 }
 0xfea   : > { %v1523_v56 = vmax.f32 %v1501_v54, 0.0  ;;  %v1524_v57 = vmax.f32 %v1521_v55, 0.0 }
 0xfec   : > { %1529 = vrot.lane.b32.xlu1 %v1524_v57, %s2480_s23  ;;  %1527 = vrot.lane.b32.xlu0 %v1523_v56, %s2480_s23 }
0x105e   : > { %v1530_v58 = vpop.permute.xlu1 %1529  ;;  %v1528_v59 = vpop.permute.xlu0 %1527 }
0x105f   : > { %v1536_v60 = vsel %vm327_vm1, %v1530_v58, 0.0  ;;  %v1531_v61 = vsel %vm327_vm1, %v1528_v59, %v1530_v58  ;;  %v1535_v62 = vsel %vm327_vm1, 0.0, %v1528_v59 }
0x1060   : > { %1573 = vrot.lane.b32.xlu0 %v1536_v60, %s2483_s20  ;;  %v2303_v63 = vpack.i.bf16 %v1531_v61, %v1535_v62 }
0x1062   : > { %2304 = vrot.lane.b32.xlu1 %v2303_v63, %s2482_s19  ;;  %2299 = vrot.lane.b32.xlu2 %v2303_v63, %s2483_s20 }
0x1068   : > { %2309 = vrot.lane.b32.xlu0 %v2303_v63, %s2481_s11 }
0x106a   : > { %1553 = vrot.lane.b32.xlu1 %v1536_v60, %s2481_s11  ;;  %1563 = vrot.lane.b32.xlu2 %v1536_v60, %s2482_s19 }
0x1070   : > { %1543 = vrot.lane.b32.xlu0 %v1536_v60, %s2484_s21 }
0x1072   : > { %1585 = vperm.xlu1 %2115, %v1582_v0   ;;  %2314 = vrot.lane.b32.xlu2 %v2303_v63, %s2484_s21 }
0x10bc   : > { %v2300_v1 = vpop.permute.xlu2 %2299 }
0x10bd   : > { %v2302_v6 = vunpack.i.h.bf16 %v2300_v1  ;;  %v2301_v7 = vunpack.i.l.bf16 %v2300_v1 }
0x10bf   : > { %v1575_v8 = vsel %vm375_vm2, %v2301_v7, %v2302_v6  ;;  %v1688_v7 = vld [vmem:[#allocation4 + $0x70] sm:$0xff] }
0x10c0   : > { %1602 = vmatpush.msra.mxu2 %v1575_v8 }
0x10c4   : > { %v1564_v9 = vpop.permute.xlu2 %1563 }
0x10cc   : > { %v2315_v18 = vpop.permute.xlu2 %2314 }
0x10cd   : > { %v2317_v20 = vunpack.i.h.bf16 %v2315_v18  ;;  %v2316_v21 = vunpack.i.l.bf16 %v2315_v18  ;;  %v1744_v18 = vld [vmem:[#allocation4 + $0x78] sm:$0xff] }
0x10cf   : > { %v1545_v27 = vsel %vm342_vm5, %v2316_v21, %v2317_v20 }
0x10d2   : > { %v1574_v10 = vpop.permute.xlu0 %1573 }
0x10d3   : > { %v1576_v2 = vsel %vm375_vm2, %v2302_v6, %v1574_v10 }
0x10d4   : > { %v2305_v4 = vpop.permute.xlu1 %2304  ;;  %1622 = vmatpush.msra.mxu3 %v1576_v2 }
0x10d5   : > { %v2307_v11 = vunpack.i.h.bf16 %v2305_v4  ;;  %v2306_v12 = vunpack.i.l.bf16 %v2305_v4 }
0x10d7   : > { %v1565_v3 = vsel %vm364_vm3, %v2306_v12, %v2307_v11  ;;  %v1566_v5 = vsel %vm364_vm3, %v2307_v11, %v1564_v9 }
0x10d8   : > { %1603 = vmatpush.msra.mxu2 %v1565_v3  ;;  %1623 = vmatpush.msra.mxu3 %v1566_v5 }
0x10da   : > { %v2310_v19 = vpop.permute.xlu0 %2309 }
0x10db   : > { %v2312_v22 = vunpack.i.h.bf16 %v2310_v19  ;;  %v2311_v23 = vunpack.i.l.bf16 %v2310_v19 }
0x10dc   : > { %v1554_v24 = vpop.permute.xlu1 %1553 }
0x10dd   : > { %v1555_v25 = vsel %vm353_vm4, %v2311_v23, %v2312_v22  ;;  %v1556_v26 = vsel %vm353_vm4, %v2312_v22, %v1554_v24 }
0x10de   : > { %1604 = vmatpush.msra.mxu2 %v1555_v25  ;;  %1624 = vmatpush.msra.mxu3 %v1556_v26 }
0x10e0   : > { %1605 = vmatpush.msra.mxu2 %v1545_v27 }
0x10e2   : > { %v1544_v29 = vpop.permute.xlu0 %1543  ;;  %2016 = vmatpush.msk.msra.mxu2 %vm2625_vm6, %v1528_v59 }
0x10e3   : > { %2017 = vmatmul.msk.f32.vlgmr.msra.gmra.mxu2 %vm387_vm7, %v1580_v28  ;;  %v1546_v30 = vsel %vm342_vm5, %v2317_v20, %v1544_v29 }
0x10e4   : > { %1625 = vmatpush.msra.mxu3 %v1546_v30  ;;  %v1586_v31 = vpop.permute.xlu1 %1585 }
0x10e6   : > { %1626 = vmatpush.msra.mxu3 %v1531_v61 }
0x10e7   : > { %2018 = vmatmul.msk.f32.vlgmr.msra.gmra.mxu3 %vm387_vm7, %v1580_v28 }
0x1166   : > { %v1608_v33 = vpop.f32.mrf.mxu2 }
0x1167   : > { %v1609_v34 = vadd.f32 %v1608_v33, %v1586_v31 }
0x1169   : > { %v1631_v35 = vmax.f32 %v1609_v34, 0.0 }
0x116a   : > { %v1628_v36 = vpop.f32.mrf.mxu3 }
0x116b   : > { %v1629_v37 = vadd.f32 %v1628_v36, %v1586_v31  ;;  %1635 = vrot.lane.b32.xlu2 %v1631_v35, %s2480_s23 }
0x116d   : > { %v1632_v38 = vmax.f32 %v1629_v37, 0.0 }
0x116f   : > { %1637 = vrot.lane.b32.xlu0 %v1632_v38, %s2480_s23 }
0x11c5   : > { %v1636_v39 = vpop.permute.xlu2 %1635 }
0x11c6   : > { %v1643_v40 = vsel %vm327_vm1, 0.0, %v1636_v39 }
0x11c7   : > { %1677 = vrot.lane.b32.xlu0 %v1643_v40, %s2483_s20 }
0x11e1   : > { %v1638_v41 = vpop.permute.xlu0 %1637 }
0x11e2   : > { %v1639_v42 = vsel %vm327_vm1, %v1636_v39, %v1638_v41  ;;  %v1644_v43 = vsel %vm327_vm1, %v1638_v41, 0.0 }
0x11e3   : > { %v2333_v44 = vpack.i.bf16 %v1644_v43, %v1639_v42 }
0x11e5   : > { %2334 = vrot.lane.b32.xlu0 %v2333_v44, %s2484_s21  ;;  %2324 = vrot.lane.b32.xlu2 %v2333_v44, %s2482_s19 }
0x11e6   : > { %2319 = vrot.lane.b32.xlu1 %v2333_v44, %s2483_s20 }
0x11ed   : > { %1693 = vperm.xlu0 %2136, %v1690_v45   ;;  %1667 = vrot.lane.b32.xlu2 %v1643_v40, %s2482_s19 }
0x11ee   : > { %2329 = vrot.lane.b32.xlu1 %v2333_v44, %s2481_s11 }
0x11f5   : > { %1647 = vrot.lane.b32.xlu2 %v1643_v40, %s2484_s21 }
0x11f6   : > { %1657 = vrot.lane.b32.xlu1 %v1643_v40, %s2481_s11 }
0x11fe   : > { %1749 = vperm.xlu1 %2115, %v1746_v46  }
0x1239   : > { %v1678_v48 = vpop.permute.xlu0 %1677 }
0x123f   : > { %v2325_v47 = vpop.permute.xlu2 %2324 }
0x1240   : > { %v2327_v50 = vunpack.i.h.bf16 %v2325_v47  ;;  %v2326_v51 = vunpack.i.l.bf16 %v2325_v47 }
0x1242   : > { %v1674_v58 = vsel %vm364_vm3, %v2326_v51, %v2327_v50 }
0x1247   : > { %v1668_v54 = vpop.permute.xlu2 %1667 }
0x1248   : > { %v1673_v57 = vsel %vm364_vm3, %v1668_v54, %v2326_v51 }
0x124f   : > { %v1648_v10 = vpop.permute.xlu2 %1647 }
0x1257   : > { %v2335_v59 = vpop.permute.xlu0 %2334 }
0x1258   : > { %v2320_v49 = vpop.permute.xlu1 %2319  ;;  %v2337_v61 = vunpack.i.h.bf16 %v2335_v59  ;;  %v2336_v62 = vunpack.i.l.bf16 %v2335_v59 }
0x1259   : > { %v2322_v52 = vunpack.i.h.bf16 %v2320_v49  ;;  %v2321_v53 = vunpack.i.l.bf16 %v2320_v49 }
0x125a   : > { %v1654_v6 = vsel %vm342_vm5, %v2336_v62, %v2337_v61  ;;  %v1653_v2 = vsel %vm342_vm5, %v1648_v10, %v2336_v62 }
0x125b   : > { %v1683_v55 = vsel %vm375_vm2, %v1678_v48, %v2321_v53  ;;  %v1684_v56 = vsel %vm375_vm2, %v2321_v53, %v2322_v52 }
0x125c   : > { %1710 = vmatpush.msrb.mxu0 %v1683_v55  ;;  %1730 = vmatpush.msrb.mxu1 %v1684_v56 }
0x125e   : > { %1711 = vmatpush.msrb.mxu0 %v1673_v57  ;;  %1731 = vmatpush.msrb.mxu1 %v1674_v58 }
0x125f   : > { %v1694_v4 = vpop.permute.xlu0 %1693 }
0x1260   : > { %v2330_v60 = vpop.permute.xlu1 %2329 }
0x1261   : > { %v2332_v63 = vunpack.i.h.bf16 %v2330_v60  ;;  %v2331_v0 = vunpack.i.l.bf16 %v2330_v60 }
0x1263   : > { %v1664_v1 = vsel %vm353_vm4, %v2331_v0, %v2332_v63 }
0x1264   : > { %1732 = vmatpush.msrb.mxu1 %v1664_v1 }
0x1266   : > { %1733 = vmatpush.msrb.mxu1 %v1654_v6 }
0x1268   : > { %v1658_v8 = vpop.permute.xlu1 %1657  ;;  %1734 = vmatpush.msrb.mxu1 %v1639_v42 }
0x1269   : > { %2022 = vmatmul.msk.f32.vlgmr.msrb.gmra.mxu1 %vm387_vm7, %v1688_v7  ;;  %v1663_v9 = vsel %vm353_vm4, %v1658_v8, %v2331_v0 }
0x126a   : > { %1712 = vmatpush.msrb.mxu0 %v1663_v9 }
0x126c   : > { %1713 = vmatpush.msrb.mxu0 %v1653_v2 }
0x126e   : > { %2020 = vmatpush.msk.msrb.mxu0 %vm2625_vm6, %v1636_v39 }
0x126f   : > { %2021 = vmatmul.msk.f32.vlgmr.msrb.gmra.mxu0 %vm387_vm7, %v1688_v7 }
0x1270   : > { %v1750_v22 = vpop.permute.xlu1 %1749 }
0x12e6   : > { %v1736_v11 = vpop.f32.mrf.mxu1 }
0x12e7   : > { %v1737_v12 = vadd.f32 %v1736_v11, %v1694_v4 }
0x12e9   : > { %v1740_v3 = vadd.f32 %v1737_v12, %v1416_v17 }
0x12eb   : > { %v1742_v5 = vmax.f32 %v1740_v3, 0.0 }
0x12ec   : > { %v1716_v19 = vpop.f32.mrf.mxu0 }
0x12ed   : > { %v1717_v20 = vadd.f32 %v1716_v19, %v1694_v4  ;;  %1790 = vmatpush.msrb.mxu3 %v1742_v5 }
0x12ee   : > { %2024 = vmatmul.msk.f32.vlgmr.msrb.gmra.mxu3 %vm277_vm8, %v1744_v18 }
0x12ef   : > { %v1739_v21 = vadd.f32 %v1717_v20, %v1415_v16 }
0x12f1   : > { %v1741_v32 = vmax.f32 %v1739_v21, 0.0 }
0x12f3   : > { %1770 = vmatpush.msrb.mxu2 %v1741_v32 }
0x12f4   : > { %2023 = vmatmul.msk.f32.vlgmr.msrb.gmra.mxu2 %vm277_vm8, %v1744_v18 }
0x1371   : > { %v1792_v23 = vpop.f32.mrf.mxu3 }
0x1372   : > { %v1793_v24 = vadd.f32 %v1792_v23, %v1750_v22 }
0x1374   : > { %v1796_v25 = vsub.f32 0.0, %v1793_v24 }
0x1376   : > { %v1799_v15 = vmul.f32 1.442695, %v1796_v25 }
0x1377   : > { %v1772_v17 = vpop.f32.mrf.mxu2 }
0x1378   : > { %2338 = vpow2.f32 %v1799_v15  ;;  %v1773_v26 = vadd.f32 %v1772_v17, %v1750_v22 }
0x137a   : > { %v1795_v27 = vsub.f32 0.0, %v1773_v26 }
0x137c   : > { %v1797_v28 = vmul.f32 1.442695, %v1795_v27 }
0x137e   : > { %v2339_v29 = vpop.eup %2338  ;;  %2340 = vpow2.f32 %v1797_v28 }
0x137f   : > { %v1802_v30 = vadd.f32 1.0, %v2339_v29 }
0x1381   : > { %2342 = vrcp.f32 %v1802_v30  ;;  %v1829_v37 = vand.u32 2147483648, %v1802_v30  ;;  %vm1823_vm11 = vweird.f32 %v1802_v30  ;;  %v1827_v39 = vand.u32 2147483647, %v1802_v30 }
0x1383   : > { %v1830_v43 = vor.u32 1.1754944e-38, %v1829_v37  ;;  %vm1828_vm13 = vcmp.eq.f32.partialorder %v1827_v39, 8.507059e+37 }
0x1384   : > { %v2341_v13 = vpop.eup %2340 }
0x1385   : > { %v1801_v16 = vadd.f32 1.0, %v2341_v13 }
0x1387   : > { %v2343_v31 = vpop.eup %2342  ;;  %2344 = vrcp.f32 %v1801_v16  ;;  %v1814_v44 = vand.u32 2147483648, %v1801_v16  ;;  %v1812_v46 = vand.u32 2147483647, %v1801_v16  ;;  %vm1808_vm15 = vweird.f32 %v1801_v16 }
0x1388   : > { %v1819_v33 = vmul.f32 %v2343_v31, %v1802_v30  ;;  %vm1824_vm10 = vweird.f32 %v2343_v31 }
0x1389   : > { %vm1825_vm12 = vmor %vm1823_vm11, %vm1824_vm10  ;;  %v1815_v49 = vor.u32 1.1754944e-38, %v1814_v44  ;;  %vm1813_vm2 = vcmp.eq.f32.partialorder %v1812_v46, 8.507059e+37 }
0x138a   : > { %v1820_v34 = vsub.f32 1.0, %v1819_v33 }
0x138c   : > { %v1821_v35 = vmul.f32 %v2343_v31, %v1820_v34 }
0x138d   : > { %v2345_v36 = vpop.eup %2344 }
0x138e   : > { %v1822_v38 = vadd.f32 %v2343_v31, %v1821_v35  ;;  %v1804_v40 = vmul.f32 %v2345_v36, %v1801_v16  ;;  %vm1809_vm14 = vweird.f32 %v2345_v36 }
0x138f   : > { %vm1810_vm1 = vmor %vm1808_vm15, %vm1809_vm14 }
0x1390   : > { %v1826_v41 = vsel %vm1825_vm12, %v2343_v31, %v1822_v38  ;;  %v1805_v42 = vsub.f32 1.0, %v1804_v40 }
0x1391   : > { %v1831_v47 = vsel %vm1828_vm13, %v1830_v43, %v1826_v41 }
0x1392   : > { %v1806_v45 = vmul.f32 %v2345_v36, %v1805_v42  ;;  %v1835_v50 = vrot.slane %v1831_v47, 7 }
0x1394   : > { %v1807_v48 = vadd.f32 %v2345_v36, %v1806_v45 }
0x1396   : > { %v1811_v51 = vsel %vm1810_vm1, %v2345_v36, %v1807_v48 }
0x1397   : > { %v1816_v52 = vsel %vm1813_vm2, %v1815_v49, %v1811_v51 }
0x1398   : > { %v1836_v53 = vsel %vm265_vm0, %v1816_v52, %v1835_v50 }
0x1399   : > { %1838 = vst.msk [vmem:[%s258_s18] sm:$0x3] %vm2796_vm9, %v1836_v53 }
0x139a PF: > { %p16_p3 = scmp.ge.s32.totalorder %s2552_s7, 4   ;;  %s3009_s15 = smov %s2466_s16 }
0x139b   : > { %s3010_s16 = smov %s2470_s17  ;;  %s3011_s17 = smov %s2563_s10 }
0x139c   : > { %s3012_s18 = smov %s2552_s7  ;;  %18 = sbr.rel (!%p16_p3) target bundleno = 4 (0x4), region = 122 }
0x13a1   :  { %1872 = vsyncpa [#allocation3], 1 }
0x13a2   :  { %1874 = vsyncpa [#allocation3 + $0x1], 1 }
0x13a3   :  { %1875 = vsyncpa [#allocation5], 1 }

</bundles_post_ra>
